<compile_context>
chip_gen: v7x
topology: tpu7x:2x2x1
jax: 0.10.0
libtpu: 0.0.40
codegen_flags: <defaults>
</compile_context>

<pallas_src>
import math
from functools import partial

import jax
import jax.numpy as jnp
from jax.experimental import pallas as pl
from jax.experimental.pallas import tpu as pltpu


def _block_kernel(num_heads, head_dim,
                  x_ref,                  # (Bt, S, D) bf16
                  wqkv_ref, bqkv_ref,     # (D, 3D) bf16, (1, 3D) f32
                  wo_ref,                 # (D, D)  bf16
                  w1_ref, b1_ref,         # (D, H)  bf16, (1, H) f32
                  w2_ref,                 # (H, D)  bf16
                  vec_ref,                # (4, D)  f32: [b_o, b_2, gamma, beta]
                  o_ref):
    Bt, S, D = x_ref.shape
    M = Bt * S
    dh = head_dim

    # Flatten the batch block so every dense matmul sees M = Bt*S rows.
    xs = x_ref[...].reshape(M, D)                                  # bf16

    # ---- fused QKV projection: one (M, D) @ (D, 3D) MXU pass, f32 accumulate ----
    qkv = jnp.dot(xs, wqkv_ref[...], preferred_element_type=jnp.float32)
    qkv = qkv + bqkv_ref[...]
    q = qkv[:, 0 * D:1 * D].astype(jnp.bfloat16)
    k = qkv[:, 1 * D:2 * D].astype(jnp.bfloat16)
    v = qkv[:, 2 * D:3 * D].astype(jnp.bfloat16)

    vecs = vec_ref[...]
    b_o, b_2, gamma, beta = vecs[0:1, :], vecs[1:2, :], vecs[2:3, :], vecs[3:4, :]

    scale = 1.0 / math.sqrt(dh)

    # ---- per-head attention, batched over Bt with 3-D einsums (no batch loop) ----
    # Head contexts are lane-concatenated once and pushed through W_o in a single
    # full-K (M, D) @ (D, D) matmul.
    ctx_heads = []
    for h in range(num_heads):
        c0 = h * dh
        # TODO(synk): at production head_dim (<128) pack heads lane-aligned / pad dh
        # to 128 so these per-head lane slices don't force XLU relayouts.
        qh = q[:, c0:c0 + dh].reshape(Bt, S, dh)
        kh = k[:, c0:c0 + dh].reshape(Bt, S, dh)
        vh = v[:, c0:c0 + dh].reshape(Bt, S, dh)
        s = jnp.einsum("bqd,bkd->bqk", qh, kh,
                       preferred_element_type=jnp.float32) * scale
        s = s - jnp.max(s, axis=-1, keepdims=True)
        p = jnp.exp(s)
        p = p * pl.reciprocal(jnp.sum(p, axis=-1, keepdims=True), approx=True)
        ctx = jnp.einsum("bqk,bkd->bqd", p.astype(jnp.bfloat16), vh,
                         preferred_element_type=jnp.float32)       # (Bt, S, dh)
        ctx_heads.append(ctx.reshape(M, dh).astype(jnp.bfloat16))
    ctx_all = ctx_heads[0] if num_heads == 1 else jnp.concatenate(ctx_heads, axis=-1)

    # ---- attention output projection: single full-K matmul (K = D) ----
    y = jnp.dot(ctx_all, wo_ref[...], preferred_element_type=jnp.float32) + b_o

    # ---- PositionwiseFeedForward: w2(relu(w1(y))) + residual, then LayerNorm ----
    h1 = jnp.dot(y.astype(jnp.bfloat16), w1_ref[...],
                 preferred_element_type=jnp.float32) + b1_ref[...]
    h1 = jnp.maximum(h1, 0.0)
    y2 = jnp.dot(h1.astype(jnp.bfloat16), w2_ref[...],
                 preferred_element_type=jnp.float32) + b_2
    z = y2 + y                                                     # residual (f32)

    mu = jnp.mean(z, axis=-1, keepdims=True)
    var = jnp.mean((z - mu) ** 2, axis=-1, keepdims=True)
    zn = (z - mu) * jax.lax.rsqrt(var + 1e-6)                      # LayerNorm eps=1e-6
    out = zn * gamma + beta

    o_ref[...] = out.reshape(Bt, S, D).astype(o_ref.dtype)


def _tpu_info():
    """(vmem_capacity_bytes, num_tensorcores_per_chip) with safe fallbacks."""
    kind = ""
    try:
        kind = jax.devices()[0].device_kind.lower()
    except Exception:
        pass
    is_v7 = "v7" in kind
    vmem = None
    try:
        vmem = int(pltpu.get_tpu_info().vmem_capacity_bytes)
    except Exception:
        vmem = None
    if vmem is None:
        vmem = (64 if is_v7 else 128) * 1024 * 1024
    num_tc = 2 if is_v7 else 1
    return vmem, num_tc


def _pick_block_b(B, S, num_tc):
    """Batch elements per grid step.

    v7x (2 TCs): keep >= 2 grid steps so both TensorCores get work, aim ~256
    M-rows per step.  v5e/v6e (1 TC): no megacore, so maximize the block
    (target ~1024 M-rows) and minimize per-step overhead.
    """
    divs = [d for d in range(1, B + 1) if B % d == 0]
    if num_tc >= 2:
        divs = [d for d in divs if B // d >= num_tc] or [1]
        target_rows = 256
    else:
        target_rows = 1024
    fitting = [d for d in divs if d * S <= target_rows]
    return max(fitting) if fitting else min(divs)


def block_forward(x, params, num_heads):
    """x: (B, S, D) float32.  params: dict of weights (already (in, out) oriented)."""
    B, S, D = x.shape
    head_dim = D // num_heads

    wdt = jnp.bfloat16
    # Fused / packed operands (fewer DMAs; bf16 weights -> half the DMA bytes).
    w_qkv = jnp.concatenate([params["wq"], params["wk"], params["wv"]], axis=1).astype(wdt)
    b_qkv = jnp.concatenate([params["bq"], params["bk"], params["bv"]], axis=1)   # (1, 3D) f32
    wo = params["wo"].astype(wdt)
    w1 = params["w1"].astype(wdt)
    w2 = params["w2"].astype(wdt)
    b1 = params["b1"]
    vecs = jnp.concatenate(
        [params["bo"], params["b2"], params["gamma"], params["beta"]], axis=0)    # (4, D) f32

    # bf16 activation input (kernel downcasts for every matmul anyway).
    x_bf = x.astype(jnp.bfloat16)
    out_dtype = x.dtype

    vmem_cap, num_tc = _tpu_info()
    block_b = _pick_block_b(B, S, num_tc)
    grid = (B // block_b,)
    kernel = partial(_block_kernel, num_heads, head_dim)

    def run(single_buffer_weights):
        def const_spec(arr):
            # Grid-invariant full-array block (constant index map -> fetched once).
            if single_buffer_weights:
                return pl.BlockSpec(arr.shape, lambda b: (0, 0),
                                    pipeline_mode=pl.Buffered(1))
            return pl.BlockSpec(arr.shape, lambda b: (0, 0))

        in_specs = [
            pl.BlockSpec((block_b, S, D), lambda b: (b, 0, 0)),     # x
            const_spec(w_qkv), const_spec(b_qkv),                   # fused QKV
            const_spec(wo),                                         # out-proj weight
            const_spec(w1), const_spec(b1), const_spec(w2),         # FFN
            const_spec(vecs),                                       # packed bias/LN vectors
        ]
        out_specs = pl.BlockSpec((block_b, S, D), lambda b: (b, 0, 0))

        out = pl.pallas_call(
            kernel,
            out_shape=jax.ShapeDtypeStruct((B, S, D), out_dtype),
            grid_spec=pltpu.PrefetchScalarGridSpec(
                num_scalar_prefetch=0,
                grid=grid,
                in_specs=in_specs,
                out_specs=out_specs,
            ),
            compiler_params=pltpu.CompilerParams(
                dimension_semantics=("parallel",),
                # ~85% of physical VMEM: ~54 MiB on v7x, ~108 MiB on v5e/v6e.
                vmem_limit_bytes=int(vmem_cap * 0.85),
            ),
        )(x_bf, w_qkv, b_qkv, wo, w1, b1, w2, vecs)
        return jax.block_until_ready(out)

    try:
        return run(single_buffer_weights=True)
    except Exception:
        # pipeline_mode=pl.Buffered(1) not supported by this jax build; fall back
        # to default double-buffering (correctness identical).
        return run(single_buffer_weights=False)


def block_reference(x, params, num_heads):
    """Pure-JAX reference mirroring nn.MultiheadAttention + PositionwiseFeedForward."""
    B, S, D = x.shape
    dh = D // num_heads
    q = x @ params["wq"] + params["bq"]
    k = x @ params["wk"] + params["bk"]
    v = x @ params["wv"] + params["bv"]

    def split(t):  # (B, S, D) -> (B, H, S, dh)
        return t.reshape(B, S, num_heads, dh).transpose(0, 2, 1, 3)

    qh, kh, vh = split(q), split(k), split(v)
    s = jnp.einsum("bhqd,bhkd->bhqk", qh, kh) / math.sqrt(dh)
    p = jax.nn.softmax(s, axis=-1)
    o = jnp.einsum("bhqk,bhkd->bhqd", p, vh).transpose(0, 2, 1, 3).reshape(B, S, D)
    y = o @ params["wo"] + params["bo"]

    residual = y
    h1 = jnp.maximum(y @ params["w1"] + params["b1"], 0.0)
    y2 = h1 @ params["w2"] + params["b2"]
    z = y2 + residual
    mu = jnp.mean(z, axis=-1, keepdims=True)
    var = jnp.mean((z - mu) ** 2, axis=-1, keepdims=True)
    zn = (z - mu) / jnp.sqrt(var + 1e-6)
    return zn * params["gamma"] + params["beta"]


def init_params(key, dim, num_heads, mlp_ratio=2.0):
    hid = int(dim * mlp_ratio)
    ks = jax.random.split(key, 10)
    std = 0.02
    p = {
        # nn.MultiheadAttention in_proj/out_proj (bias=True by default) — stored (in, out)
        "wq": jax.random.normal(ks[0], (dim, dim), jnp.float32) * std,
        "wk": jax.random.normal(ks[1], (dim, dim), jnp.float32) * std,
        "wv": jax.random.normal(ks[2], (dim, dim), jnp.float32) * std,
        "bq": jax.random.normal(ks[3], (1, dim), jnp.float32) * std,
        "bk": jax.random.normal(ks[4], (1, dim), jnp.float32) * std,
        "bv": jax.random.normal(ks[5], (1, dim), jnp.float32) * std,
        "wo": jax.random.normal(ks[6], (dim, dim), jnp.float32) * std,
        "bo": jnp.zeros((1, dim), jnp.float32),
        # PositionwiseFeedForward
        "w1": jax.random.normal(ks[7], (dim, hid), jnp.float32) * std,
        "b1": jax.random.normal(ks[8], (1, hid), jnp.float32) * std,
        "w2": jax.random.normal(ks[9], (hid, dim), jnp.float32) * std,
        "b2": jnp.zeros((1, dim), jnp.float32),
        # LayerNorm(dim, eps=1e-6)
        "gamma": jnp.ones((1, dim), jnp.float32),
        "beta": jnp.zeros((1, dim), jnp.float32),
    }
    return p


if __name__ == "__main__":
    B, S, D, H = 2, 8, 32, 4          # batch, seq, dim, num_heads
    key = jax.random.PRNGKey(0)
    kx, kp = jax.random.split(key)
    x = jax.random.normal(kx, (B, S, D), jnp.float32)
    params = init_params(kp, D, H, mlp_ratio=2.0)

    out = jax.block_until_ready(block_forward(x, params, num_heads=H))

    # The kernel rounds weights AND activations through bf16 (f32 accumulate);
    # compare against a reference with bf16-rounded weights and input so only
    # intermediate-activation rounding differs.
    rparams = dict(params)
    for name in ("wq", "wk", "wv", "wo", "w1", "w2"):
        rparams[name] = params[name].astype(jnp.bfloat16).astype(jnp.float32)
    x_r = x.astype(jnp.bfloat16).astype(jnp.float32)
    ref = block_reference(x_r, rparams, num_heads=H)

    assert out.shape == (B, S, D)
    err = float(jnp.max(jnp.abs(out - ref)))
    assert err < 5e-2, f"mismatch vs reference: max abs err {err}"

    print("KERNEL_OK")
</pallas_src>

<mosaic_0001>
module attributes {stable_mosaic.version = 11 : i64} {
  func.func @_block_kernel(%arg0: i32, %arg1: memref<2x8x32xbf16, #tpu.memory_space<vmem>>, %arg2: memref<32x96xbf16, #tpu.memory_space<vmem>>, %arg3: memref<1x96xf32, #tpu.memory_space<vmem>>, %arg4: memref<32x32xbf16, #tpu.memory_space<vmem>>, %arg5: memref<32x64xbf16, #tpu.memory_space<vmem>>, %arg6: memref<1x64xf32, #tpu.memory_space<vmem>>, %arg7: memref<64x32xbf16, #tpu.memory_space<vmem>>, %arg8: memref<4x32xf32, #tpu.memory_space<vmem>>, %arg9: memref<2x8x32xf32, #tpu.memory_space<vmem>>) attributes {dimension_semantics = [#tpu.dimension_semantics<parallel>], iteration_bounds = array<i64: 1>, scalar_prefetch = 0 : i64, scratch_operands = 0 : i64, tpu.core_type = #tpu.core_type<tc>, window_params = [{transform_indices = @transform_0, window_bounds = array<i64: 2, 8, 32>}, {pipeline_mode = #tpu.pipeline_mode<synchronous>, transform_indices = @transform_1, window_bounds = array<i64: 32, 96>}, {pipeline_mode = #tpu.pipeline_mode<synchronous>, transform_indices = @transform_2, window_bounds = array<i64: 1, 96>}, {pipeline_mode = #tpu.pipeline_mode<synchronous>, transform_indices = @transform_3, window_bounds = array<i64: 32, 32>}, {pipeline_mode = #tpu.pipeline_mode<synchronous>, transform_indices = @transform_4, window_bounds = array<i64: 32, 64>}, {pipeline_mode = #tpu.pipeline_mode<synchronous>, transform_indices = @transform_5, window_bounds = array<i64: 1, 64>}, {pipeline_mode = #tpu.pipeline_mode<synchronous>, transform_indices = @transform_6, window_bounds = array<i64: 64, 32>}, {pipeline_mode = #tpu.pipeline_mode<synchronous>, transform_indices = @transform_7, window_bounds = array<i64: 4, 32>}, {transform_indices = @transform_8, window_bounds = array<i64: 2, 8, 32>}]} {
    %c0 = arith.constant 0 : index
    %c0_0 = arith.constant 0 : index
    %c0_1 = arith.constant 0 : index
    %0 = vector.load %arg1[%c0, %c0_0, %c0_1] : memref<2x8x32xbf16, #tpu.memory_space<vmem>>, vector<2x8x32xbf16>
    %1 = vector.shape_cast %0 : vector<2x8x32xbf16> to vector<16x32xbf16>
    %c0_2 = arith.constant 0 : index
    %c0_3 = arith.constant 0 : index
    %2 = vector.load %arg2[%c0_2, %c0_3] : memref<32x96xbf16, #tpu.memory_space<vmem>>, vector<32x96xbf16>
    %cst = arith.constant dense<0.000000e+00> : vector<16x96xf32>
    %3 = tpu.matmul %1, %2, %cst {dimension_numbers = #tpu.dot_dimension_numbers<[1], [0], [0], [1], [0, 0, 1, 1], [], []>} : vector<16x32xbf16>, vector<32x96xbf16>, vector<16x96xf32> -> vector<16x96xf32>
    %c0_4 = arith.constant 0 : index
    %c0_5 = arith.constant 0 : index
    %4 = vector.load %arg3[%c0_4, %c0_5] : memref<1x96xf32, #tpu.memory_space<vmem>>, vector<1x96xf32>
    %5 = vector.broadcast %4 : vector<1x96xf32> to vector<16x96xf32>
    %6 = arith.addf %3, %5 : vector<16x96xf32>
    %7 = vector.extract_strided_slice %6 {offsets = [0, 0], sizes = [16, 32], strides = [1, 1]} : vector<16x96xf32> to vector<16x32xf32>
    %8 = arith.truncf %7 : vector<16x32xf32> to vector<16x32xbf16>
    %9 = vector.extract_strided_slice %6 {offsets = [0, 32], sizes = [16, 32], strides = [1, 1]} : vector<16x96xf32> to vector<16x32xf32>
    %10 = arith.truncf %9 : vector<16x32xf32> to vector<16x32xbf16>
    %11 = vector.extract_strided_slice %6 {offsets = [0, 64], sizes = [16, 32], strides = [1, 1]} : vector<16x96xf32> to vector<16x32xf32>
    %12 = arith.truncf %11 : vector<16x32xf32> to vector<16x32xbf16>
    %c0_6 = arith.constant 0 : index
    %c0_7 = arith.constant 0 : index
    %13 = vector.load %arg8[%c0_6, %c0_7] : memref<4x32xf32, #tpu.memory_space<vmem>>, vector<4x32xf32>
    %14 = vector.extract_strided_slice %13 {offsets = [0, 0], sizes = [1, 32], strides = [1, 1]} : vector<4x32xf32> to vector<1x32xf32>
    %15 = vector.extract_strided_slice %13 {offsets = [1, 0], sizes = [1, 32], strides = [1, 1]} : vector<4x32xf32> to vector<1x32xf32>
    %16 = vector.extract_strided_slice %13 {offsets = [2, 0], sizes = [1, 32], strides = [1, 1]} : vector<4x32xf32> to vector<1x32xf32>
    %17 = vector.extract_strided_slice %13 {offsets = [3, 0], sizes = [1, 32], strides = [1, 1]} : vector<4x32xf32> to vector<1x32xf32>
    %18 = vector.extract_strided_slice %8 {offsets = [0, 0], sizes = [16, 8], strides = [1, 1]} : vector<16x32xbf16> to vector<16x8xbf16>
    %19 = vector.shape_cast %18 : vector<16x8xbf16> to vector<2x8x8xbf16>
    %20 = vector.extract_strided_slice %10 {offsets = [0, 0], sizes = [16, 8], strides = [1, 1]} : vector<16x32xbf16> to vector<16x8xbf16>
    %21 = vector.shape_cast %20 : vector<16x8xbf16> to vector<2x8x8xbf16>
    %22 = vector.extract_strided_slice %12 {offsets = [0, 0], sizes = [16, 8], strides = [1, 1]} : vector<16x32xbf16> to vector<16x8xbf16>
    %23 = vector.shape_cast %22 : vector<16x8xbf16> to vector<2x8x8xbf16>
    "tpu.trace_start"() <{level = 10 : i32, message = "bqd,bkd->bqk"}> : () -> ()
    %cst_8 = arith.constant dense<0.000000e+00> : vector<2x8x8xf32>
    %24 = tpu.matmul %19, %21, %cst_8 {dimension_numbers = #tpu.dot_dimension_numbers<[2], [2], [1], [1], [0, 0, 0, 1, 1, 1], [0], [0]>} : vector<2x8x8xbf16>, vector<2x8x8xbf16>, vector<2x8x8xf32> -> vector<2x8x8xf32>
    "tpu.trace_stop"() : () -> ()
    %cst_9 = arith.constant 0.353553385 : f32
    %25 = vector.broadcast %cst_9 : f32 to vector<2x8x8xf32>
    %26 = arith.mulf %24, %25 : vector<2x8x8xf32>
    %cst_10 = arith.constant dense<0xFF800000> : vector<2x8xf32>
    %27 = vector.multi_reduction <maximumf>, %26, %cst_10 [2] : vector<2x8x8xf32> to vector<2x8xf32>
    %28 = vector.shape_cast %27 : vector<2x8xf32> to vector<2x8x1xf32>
    %29 = vector.broadcast %28 : vector<2x8x1xf32> to vector<2x8x8xf32>
    %30 = arith.subf %26, %29 : vector<2x8x8xf32>
    %31 = math.exp %30 : vector<2x8x8xf32>
    %cst_11 = arith.constant dense<0.000000e+00> : vector<2x8xf32>
    %32 = vector.multi_reduction <add>, %31, %cst_11 [2] : vector<2x8x8xf32> to vector<2x8xf32>
    %33 = vector.shape_cast %32 : vector<2x8xf32> to vector<2x8x1xf32>
    %34 = tpu.reciprocal %33 {approx = true} : vector<2x8x1xf32> -> vector<2x8x1xf32>
    %35 = vector.broadcast %34 : vector<2x8x1xf32> to vector<2x8x8xf32>
    %36 = arith.mulf %31, %35 : vector<2x8x8xf32>
    %37 = arith.truncf %36 : vector<2x8x8xf32> to vector<2x8x8xbf16>
    "tpu.trace_start"() <{level = 10 : i32, message = "bqk,bkd->bqd"}> : () -> ()
    %cst_12 = arith.constant dense<0.000000e+00> : vector<2x8x8xf32>
    %38 = tpu.matmul %37, %23, %cst_12 {dimension_numbers = #tpu.dot_dimension_numbers<[2], [1], [1], [2], [0, 0, 0, 1, 1, 2], [0], [0]>} : vector<2x8x8xbf16>, vector<2x8x8xbf16>, vector<2x8x8xf32> -> vector<2x8x8xf32>
    "tpu.trace_stop"() : () -> ()
    %39 = vector.shape_cast %38 : vector<2x8x8xf32> to vector<16x8xf32>
    %40 = arith.truncf %39 : vector<16x8xf32> to vector<16x8xbf16>
    %41 = vector.extract_strided_slice %8 {offsets = [0, 8], sizes = [16, 8], strides = [1, 1]} : vector<16x32xbf16> to vector<16x8xbf16>
    %42 = vector.shape_cast %41 : vector<16x8xbf16> to vector<2x8x8xbf16>
    %43 = vector.extract_strided_slice %10 {offsets = [0, 8], sizes = [16, 8], strides = [1, 1]} : vector<16x32xbf16> to vector<16x8xbf16>
    %44 = vector.shape_cast %43 : vector<16x8xbf16> to vector<2x8x8xbf16>
    %45 = vector.extract_strided_slice %12 {offsets = [0, 8], sizes = [16, 8], strides = [1, 1]} : vector<16x32xbf16> to vector<16x8xbf16>
    %46 = vector.shape_cast %45 : vector<16x8xbf16> to vector<2x8x8xbf16>
    "tpu.trace_start"() <{level = 10 : i32, message = "bqd,bkd->bqk"}> : () -> ()
    %cst_13 = arith.constant dense<0.000000e+00> : vector<2x8x8xf32>
    %47 = tpu.matmul %42, %44, %cst_13 {dimension_numbers = #tpu.dot_dimension_numbers<[2], [2], [1], [1], [0, 0, 0, 1, 1, 1], [0], [0]>} : vector<2x8x8xbf16>, vector<2x8x8xbf16>, vector<2x8x8xf32> -> vector<2x8x8xf32>
    "tpu.trace_stop"() : () -> ()
    %cst_14 = arith.constant 0.353553385 : f32
    %48 = vector.broadcast %cst_14 : f32 to vector<2x8x8xf32>
    %49 = arith.mulf %47, %48 : vector<2x8x8xf32>
    %cst_15 = arith.constant dense<0xFF800000> : vector<2x8xf32>
    %50 = vector.multi_reduction <maximumf>, %49, %cst_15 [2] : vector<2x8x8xf32> to vector<2x8xf32>
    %51 = vector.shape_cast %50 : vector<2x8xf32> to vector<2x8x1xf32>
    %52 = vector.broadcast %51 : vector<2x8x1xf32> to vector<2x8x8xf32>
    %53 = arith.subf %49, %52 : vector<2x8x8xf32>
    %54 = math.exp %53 : vector<2x8x8xf32>
    %cst_16 = arith.constant dense<0.000000e+00> : vector<2x8xf32>
    %55 = vector.multi_reduction <add>, %54, %cst_16 [2] : vector<2x8x8xf32> to vector<2x8xf32>
    %56 = vector.shape_cast %55 : vector<2x8xf32> to vector<2x8x1xf32>
    %57 = tpu.reciprocal %56 {approx = true} : vector<2x8x1xf32> -> vector<2x8x1xf32>
    %58 = vector.broadcast %57 : vector<2x8x1xf32> to vector<2x8x8xf32>
    %59 = arith.mulf %54, %58 : vector<2x8x8xf32>
    %60 = arith.truncf %59 : vector<2x8x8xf32> to vector<2x8x8xbf16>
    "tpu.trace_start"() <{level = 10 : i32, message = "bqk,bkd->bqd"}> : () -> ()
    %cst_17 = arith.constant dense<0.000000e+00> : vector<2x8x8xf32>
    %61 = tpu.matmul %60, %46, %cst_17 {dimension_numbers = #tpu.dot_dimension_numbers<[2], [1], [1], [2], [0, 0, 0, 1, 1, 2], [0], [0]>} : vector<2x8x8xbf16>, vector<2x8x8xbf16>, vector<2x8x8xf32> -> vector<2x8x8xf32>
    "tpu.trace_stop"() : () -> ()
    %62 = vector.shape_cast %61 : vector<2x8x8xf32> to vector<16x8xf32>
    %63 = arith.truncf %62 : vector<16x8xf32> to vector<16x8xbf16>
    %64 = vector.extract_strided_slice %8 {offsets = [0, 16], sizes = [16, 8], strides = [1, 1]} : vector<16x32xbf16> to vector<16x8xbf16>
    %65 = vector.shape_cast %64 : vector<16x8xbf16> to vector<2x8x8xbf16>
    %66 = vector.extract_strided_slice %10 {offsets = [0, 16], sizes = [16, 8], strides = [1, 1]} : vector<16x32xbf16> to vector<16x8xbf16>
    %67 = vector.shape_cast %66 : vector<16x8xbf16> to vector<2x8x8xbf16>
    %68 = vector.extract_strided_slice %12 {offsets = [0, 16], sizes = [16, 8], strides = [1, 1]} : vector<16x32xbf16> to vector<16x8xbf16>
    %69 = vector.shape_cast %68 : vector<16x8xbf16> to vector<2x8x8xbf16>
    "tpu.trace_start"() <{level = 10 : i32, message = "bqd,bkd->bqk"}> : () -> ()
    %cst_18 = arith.constant dense<0.000000e+00> : vector<2x8x8xf32>
    %70 = tpu.matmul %65, %67, %cst_18 {dimension_numbers = #tpu.dot_dimension_numbers<[2], [2], [1], [1], [0, 0, 0, 1, 1, 1], [0], [0]>} : vector<2x8x8xbf16>, vector<2x8x8xbf16>, vector<2x8x8xf32> -> vector<2x8x8xf32>
    "tpu.trace_stop"() : () -> ()
    %cst_19 = arith.constant 0.353553385 : f32
    %71 = vector.broadcast %cst_19 : f32 to vector<2x8x8xf32>
    %72 = arith.mulf %70, %71 : vector<2x8x8xf32>
    %cst_20 = arith.constant dense<0xFF800000> : vector<2x8xf32>
    %73 = vector.multi_reduction <maximumf>, %72, %cst_20 [2] : vector<2x8x8xf32> to vector<2x8xf32>
    %74 = vector.shape_cast %73 : vector<2x8xf32> to vector<2x8x1xf32>
    %75 = vector.broadcast %74 : vector<2x8x1xf32> to vector<2x8x8xf32>
    %76 = arith.subf %72, %75 : vector<2x8x8xf32>
    %77 = math.exp %76 : vector<2x8x8xf32>
    %cst_21 = arith.constant dense<0.000000e+00> : vector<2x8xf32>
    %78 = vector.multi_reduction <add>, %77, %cst_21 [2] : vector<2x8x8xf32> to vector<2x8xf32>
    %79 = vector.shape_cast %78 : vector<2x8xf32> to vector<2x8x1xf32>
    %80 = tpu.reciprocal %79 {approx = true} : vector<2x8x1xf32> -> vector<2x8x1xf32>
    %81 = vector.broadcast %80 : vector<2x8x1xf32> to vector<2x8x8xf32>
    %82 = arith.mulf %77, %81 : vector<2x8x8xf32>
    %83 = arith.truncf %82 : vector<2x8x8xf32> to vector<2x8x8xbf16>
    "tpu.trace_start"() <{level = 10 : i32, message = "bqk,bkd->bqd"}> : () -> ()
    %cst_22 = arith.constant dense<0.000000e+00> : vector<2x8x8xf32>
    %84 = tpu.matmul %83, %69, %cst_22 {dimension_numbers = #tpu.dot_dimension_numbers<[2], [1], [1], [2], [0, 0, 0, 1, 1, 2], [0], [0]>} : vector<2x8x8xbf16>, vector<2x8x8xbf16>, vector<2x8x8xf32> -> vector<2x8x8xf32>
    "tpu.trace_stop"() : () -> ()
    %85 = vector.shape_cast %84 : vector<2x8x8xf32> to vector<16x8xf32>
    %86 = arith.truncf %85 : vector<16x8xf32> to vector<16x8xbf16>
    %87 = vector.extract_strided_slice %8 {offsets = [0, 24], sizes = [16, 8], strides = [1, 1]} : vector<16x32xbf16> to vector<16x8xbf16>
    %88 = vector.shape_cast %87 : vector<16x8xbf16> to vector<2x8x8xbf16>
    %89 = vector.extract_strided_slice %10 {offsets = [0, 24], sizes = [16, 8], strides = [1, 1]} : vector<16x32xbf16> to vector<16x8xbf16>
    %90 = vector.shape_cast %89 : vector<16x8xbf16> to vector<2x8x8xbf16>
    %91 = vector.extract_strided_slice %12 {offsets = [0, 24], sizes = [16, 8], strides = [1, 1]} : vector<16x32xbf16> to vector<16x8xbf16>
    %92 = vector.shape_cast %91 : vector<16x8xbf16> to vector<2x8x8xbf16>
    "tpu.trace_start"() <{level = 10 : i32, message = "bqd,bkd->bqk"}> : () -> ()
    %cst_23 = arith.constant dense<0.000000e+00> : vector<2x8x8xf32>
    %93 = tpu.matmul %88, %90, %cst_23 {dimension_numbers = #tpu.dot_dimension_numbers<[2], [2], [1], [1], [0, 0, 0, 1, 1, 1], [0], [0]>} : vector<2x8x8xbf16>, vector<2x8x8xbf16>, vector<2x8x8xf32> -> vector<2x8x8xf32>
    "tpu.trace_stop"() : () -> ()
    %cst_24 = arith.constant 0.353553385 : f32
    %94 = vector.broadcast %cst_24 : f32 to vector<2x8x8xf32>
    %95 = arith.mulf %93, %94 : vector<2x8x8xf32>
    %cst_25 = arith.constant dense<0xFF800000> : vector<2x8xf32>
    %96 = vector.multi_reduction <maximumf>, %95, %cst_25 [2] : vector<2x8x8xf32> to vector<2x8xf32>
    %97 = vector.shape_cast %96 : vector<2x8xf32> to vector<2x8x1xf32>
    %98 = vector.broadcast %97 : vector<2x8x1xf32> to vector<2x8x8xf32>
    %99 = arith.subf %95, %98 : vector<2x8x8xf32>
    %100 = math.exp %99 : vector<2x8x8xf32>
    %cst_26 = arith.constant dense<0.000000e+00> : vector<2x8xf32>
    %101 = vector.multi_reduction <add>, %100, %cst_26 [2] : vector<2x8x8xf32> to vector<2x8xf32>
    %102 = vector.shape_cast %101 : vector<2x8xf32> to vector<2x8x1xf32>
    %103 = tpu.reciprocal %102 {approx = true} : vector<2x8x1xf32> -> vector<2x8x1xf32>
    %104 = vector.broadcast %103 : vector<2x8x1xf32> to vector<2x8x8xf32>
    %105 = arith.mulf %100, %104 : vector<2x8x8xf32>
    %106 = arith.truncf %105 : vector<2x8x8xf32> to vector<2x8x8xbf16>
    "tpu.trace_start"() <{level = 10 : i32, message = "bqk,bkd->bqd"}> : () -> ()
    %cst_27 = arith.constant dense<0.000000e+00> : vector<2x8x8xf32>
    %107 = tpu.matmul %106, %92, %cst_27 {dimension_numbers = #tpu.dot_dimension_numbers<[2], [1], [1], [2], [0, 0, 0, 1, 1, 2], [0], [0]>} : vector<2x8x8xbf16>, vector<2x8x8xbf16>, vector<2x8x8xf32> -> vector<2x8x8xf32>
    "tpu.trace_stop"() : () -> ()
    %108 = vector.shape_cast %107 : vector<2x8x8xf32> to vector<16x8xf32>
    %109 = arith.truncf %108 : vector<16x8xf32> to vector<16x8xbf16>
    %110 = tpu.concatenate %40, %63, %86, %109 in 1 : vector<16x8xbf16>, vector<16x8xbf16>, vector<16x8xbf16>, vector<16x8xbf16> -> vector<16x32xbf16>
    %c0_28 = arith.constant 0 : index
    %c0_29 = arith.constant 0 : index
    %111 = vector.load %arg4[%c0_28, %c0_29] : memref<32x32xbf16, #tpu.memory_space<vmem>>, vector<32x32xbf16>
    %cst_30 = arith.constant dense<0.000000e+00> : vector<16x32xf32>
    %112 = tpu.matmul %110, %111, %cst_30 {dimension_numbers = #tpu.dot_dimension_numbers<[1], [0], [0], [1], [0, 0, 1, 1], [], []>} : vector<16x32xbf16>, vector<32x32xbf16>, vector<16x32xf32> -> vector<16x32xf32>
    %113 = vector.broadcast %14 : vector<1x32xf32> to vector<16x32xf32>
    %114 = arith.addf %112, %113 : vector<16x32xf32>
    %115 = arith.truncf %114 : vector<16x32xf32> to vector<16x32xbf16>
    %c0_31 = arith.constant 0 : index
    %c0_32 = arith.constant 0 : index
    %116 = vector.load %arg5[%c0_31, %c0_32] : memref<32x64xbf16, #tpu.memory_space<vmem>>, vector<32x64xbf16>
    %cst_33 = arith.constant dense<0.000000e+00> : vector<16x64xf32>
    %117 = tpu.matmul %115, %116, %cst_33 {dimension_numbers = #tpu.dot_dimension_numbers<[1], [0], [0], [1], [0, 0, 1, 1], [], []>} : vector<16x32xbf16>, vector<32x64xbf16>, vector<16x64xf32> -> vector<16x64xf32>
    %c0_34 = arith.constant 0 : index
    %c0_35 = arith.constant 0 : index
    %118 = vector.load %arg6[%c0_34, %c0_35] : memref<1x64xf32, #tpu.memory_space<vmem>>, vector<1x64xf32>
    %119 = vector.broadcast %118 : vector<1x64xf32> to vector<16x64xf32>
    %120 = arith.addf %117, %119 : vector<16x64xf32>
    %cst_36 = arith.constant 0.000000e+00 : f32
    %121 = vector.broadcast %cst_36 : f32 to vector<16x64xf32>
    %122 = arith.maximumf %120, %121 : vector<16x64xf32>
    %123 = arith.truncf %122 : vector<16x64xf32> to vector<16x64xbf16>
    %c0_37 = arith.constant 0 : index
    %c0_38 = arith.constant 0 : index
    %124 = vector.load %arg7[%c0_37, %c0_38] : memref<64x32xbf16, #tpu.memory_space<vmem>>, vector<64x32xbf16>
    %cst_39 = arith.constant dense<0.000000e+00> : vector<16x32xf32>
    %125 = tpu.matmul %123, %124, %cst_39 {dimension_numbers = #tpu.dot_dimension_numbers<[1], [0], [0], [1], [0, 0, 1, 1], [], []>} : vector<16x64xbf16>, vector<64x32xbf16>, vector<16x32xf32> -> vector<16x32xf32>
    %126 = vector.broadcast %15 : vector<1x32xf32> to vector<16x32xf32>
    %127 = arith.addf %125, %126 : vector<16x32xf32>
    %128 = arith.addf %127, %114 : vector<16x32xf32>
    %cst_40 = arith.constant dense<0.000000e+00> : vector<16xf32>
    %129 = vector.multi_reduction <add>, %128, %cst_40 [1] : vector<16x32xf32> to vector<16xf32>
    %130 = vector.shape_cast %129 : vector<16xf32> to vector<16x1xf32>
    %cst_41 = arith.constant 3.200000e+01 : f32
    %131 = vector.broadcast %cst_41 : f32 to vector<16x1xf32>
    %132 = arith.divf %130, %131 : vector<16x1xf32>
    %133 = vector.broadcast %132 : vector<16x1xf32> to vector<16x32xf32>
    %134 = arith.subf %128, %133 : vector<16x32xf32>
    %135 = arith.mulf %134, %134 : vector<16x32xf32>
    %cst_42 = arith.constant dense<0.000000e+00> : vector<16xf32>
    %136 = vector.multi_reduction <add>, %135, %cst_42 [1] : vector<16x32xf32> to vector<16xf32>
    %137 = vector.shape_cast %136 : vector<16xf32> to vector<16x1xf32>
    %cst_43 = arith.constant 3.200000e+01 : f32
    %138 = vector.broadcast %cst_43 : f32 to vector<16x1xf32>
    %139 = arith.divf %137, %138 : vector<16x1xf32>
    %140 = vector.broadcast %132 : vector<16x1xf32> to vector<16x32xf32>
    %141 = arith.subf %128, %140 : vector<16x32xf32>
    %cst_44 = arith.constant 9.99999997E-7 : f32
    %142 = vector.broadcast %cst_44 : f32 to vector<16x1xf32>
    %143 = arith.addf %139, %142 : vector<16x1xf32>
    %144 = math.rsqrt %143 : vector<16x1xf32>
    %145 = vector.broadcast %144 : vector<16x1xf32> to vector<16x32xf32>
    %146 = arith.mulf %141, %145 : vector<16x32xf32>
    %147 = vector.broadcast %16 : vector<1x32xf32> to vector<16x32xf32>
    %148 = arith.mulf %146, %147 : vector<16x32xf32>
    %149 = vector.broadcast %17 : vector<1x32xf32> to vector<16x32xf32>
    %150 = arith.addf %148, %149 : vector<16x32xf32>
    %151 = vector.shape_cast %150 : vector<16x32xf32> to vector<2x8x32xf32>
    %c0_45 = arith.constant 0 : index
    %c0_46 = arith.constant 0 : index
    %c0_47 = arith.constant 0 : index
    %152 = vector.load %arg9[%c0_45, %c0_46, %c0_47] : memref<2x8x32xf32, #tpu.memory_space<vmem>>, vector<2x8x32xf32>
    tpu.vector_store %arg9[%c0_45, %c0_46, %c0_47], %151 {strides = array<i32>} : memref<2x8x32xf32, #tpu.memory_space<vmem>>, vector<2x8x32xf32>,
    return
  }
  func.func @transform_0(%arg0: i32) -> (i32, i32, i32) {
    %c0_i32 = arith.constant 0 : i32
    %c0_i32_0 = arith.constant 0 : i32
    %c0_i32_1 = arith.constant 0 : i32
    return %arg0, %c0_i32, %c0_i32_0 : i32, i32, i32
  }
  func.func @transform_1(%arg0: i32) -> (i32, i32) {
    %c0_i32 = arith.constant 0 : i32
    %c0_i32_0 = arith.constant 0 : i32
    %c0_i32_1 = arith.constant 0 : i32
    return %c0_i32, %c0_i32_0 : i32, i32
  }
  func.func @transform_2(%arg0: i32) -> (i32, i32) {
    %c0_i32 = arith.constant 0 : i32
    %c0_i32_0 = arith.constant 0 : i32
    %c0_i32_1 = arith.constant 0 : i32
    return %c0_i32, %c0_i32_0 : i32, i32
  }
  func.func @transform_3(%arg0: i32) -> (i32, i32) {
    %c0_i32 = arith.constant 0 : i32
    %c0_i32_0 = arith.constant 0 : i32
    %c0_i32_1 = arith.constant 0 : i32
    return %c0_i32, %c0_i32_0 : i32, i32
  }
  func.func @transform_4(%arg0: i32) -> (i32, i32) {
    %c0_i32 = arith.constant 0 : i32
    %c0_i32_0 = arith.constant 0 : i32
    %c0_i32_1 = arith.constant 0 : i32
    return %c0_i32, %c0_i32_0 : i32, i32
  }
  func.func @transform_5(%arg0: i32) -> (i32, i32) {
    %c0_i32 = arith.constant 0 : i32
    %c0_i32_0 = arith.constant 0 : i32
    %c0_i32_1 = arith.constant 0 : i32
    return %c0_i32, %c0_i32_0 : i32, i32
  }
  func.func @transform_6(%arg0: i32) -> (i32, i32) {
    %c0_i32 = arith.constant 0 : i32
    %c0_i32_0 = arith.constant 0 : i32
    %c0_i32_1 = arith.constant 0 : i32
    return %c0_i32, %c0_i32_0 : i32, i32
  }
  func.func @transform_7(%arg0: i32) -> (i32, i32) {
    %c0_i32 = arith.constant 0 : i32
    %c0_i32_0 = arith.constant 0 : i32
    %c0_i32_1 = arith.constant 0 : i32
    return %c0_i32, %c0_i32_0 : i32, i32
  }
  func.func @transform_8(%arg0: i32) -> (i32, i32, i32) {
    %c0_i32 = arith.constant 0 : i32
    %c0_i32_0 = arith.constant 0 : i32
    %c0_i32_1 = arith.constant 0 : i32
    return %arg0, %c0_i32, %c0_i32_0 : i32, i32, i32
  }
}

module attributes {stable_mosaic.version = 11 : i64} {
  func.func @_block_kernel(%arg0: i32, %arg1: memref<2x8x32xbf16, #tpu.memory_space<vmem>>, %arg2: memref<32x96xbf16, #tpu.memory_space<vmem>>, %arg3: memref<1x96xf32, #tpu.memory_space<vmem>>, %arg4: memref<32x32xbf16, #tpu.memory_space<vmem>>, %arg5: memref<32x64xbf16, #tpu.memory_space<vmem>>, %arg6: memref<1x64xf32, #tpu.memory_space<vmem>>, %arg7: memref<64x32xbf16, #tpu.memory_space<vmem>>, %arg8: memref<4x32xf32, #tpu.memory_space<vmem>>, %arg9: memref<2x8x32xf32, #tpu.memory_space<vmem>>) attributes {dimension_semantics = [#tpu.dimension_semantics<parallel>], iteration_bounds = array<i64: 1>, scalar_prefetch = 0 : i64, scratch_operands = 0 : i64, tpu.core_type = #tpu.core_type<tc>, window_params = [{transform_indices = @transform_0, window_bounds = array<i64: 2, 8, 32>}, {pipeline_mode = #tpu.pipeline_mode<synchronous>, transform_indices = @transform_1, window_bounds = array<i64: 32, 96>}, {pipeline_mode = #tpu.pipeline_mode<synchronous>, transform_indices = @transform_2, window_bounds = array<i64: 1, 96>}, {pipeline_mode = #tpu.pipeline_mode<synchronous>, transform_indices = @transform_3, window_bounds = array<i64: 32, 32>}, {pipeline_mode = #tpu.pipeline_mode<synchronous>, transform_indices = @transform_4, window_bounds = array<i64: 32, 64>}, {pipeline_mode = #tpu.pipeline_mode<synchronous>, transform_indices = @transform_5, window_bounds = array<i64: 1, 64>}, {pipeline_mode = #tpu.pipeline_mode<synchronous>, transform_indices = @transform_6, window_bounds = array<i64: 64, 32>}, {pipeline_mode = #tpu.pipeline_mode<synchronous>, transform_indices = @transform_7, window_bounds = array<i64: 4, 32>}, {transform_indices = @transform_8, window_bounds = array<i64: 2, 8, 32>}]} {
    %c0 = arith.constant 0 : index
    %c0_0 = arith.constant 0 : index
    %c0_1 = arith.constant 0 : index
    %0 = vector.load %arg1[%c0, %c0_0, %c0_1] : memref<2x8x32xbf16, #tpu.memory_space<vmem>>, vector<2x8x32xbf16>
    %1 = vector.shape_cast %0 : vector<2x8x32xbf16> to vector<16x32xbf16>
    %c0_2 = arith.constant 0 : index
    %c0_3 = arith.constant 0 : index
    %2 = vector.load %arg2[%c0_2, %c0_3] : memref<32x96xbf16, #tpu.memory_space<vmem>>, vector<32x96xbf16>
    %cst = arith.constant dense<0.000000e+00> : vector<16x96xf32>
    %3 = tpu.matmul %1, %2, %cst {dimension_numbers = #tpu.dot_dimension_numbers<[1], [0], [0], [1], [0, 0, 1, 1], [], []>} : vector<16x32xbf16>, vector<32x96xbf16>, vector<16x96xf32> -> vector<16x96xf32>
    %c0_4 = arith.constant 0 : index
    %c0_5 = arith.constant 0 : index
    %4 = vector.load %arg3[%c0_4, %c0_5] : memref<1x96xf32, #tpu.memory_space<vmem>>, vector<1x96xf32>
    %5 = vector.broadcast %4 : vector<1x96xf32> to vector<16x96xf32>
    %6 = arith.addf %3, %5 : vector<16x96xf32>
    %7 = vector.extract_strided_slice %6 {offsets = [0, 0], sizes = [16, 32], strides = [1, 1]} : vector<16x96xf32> to vector<16x32xf32>
    %8 = arith.truncf %7 : vector<16x32xf32> to vector<16x32xbf16>
    %9 = vector.extract_strided_slice %6 {offsets = [0, 32], sizes = [16, 32], strides = [1, 1]} : vector<16x96xf32> to vector<16x32xf32>
    %10 = arith.truncf %9 : vector<16x32xf32> to vector<16x32xbf16>
    %11 = vector.extract_strided_slice %6 {offsets = [0, 64], sizes = [16, 32], strides = [1, 1]} : vector<16x96xf32> to vector<16x32xf32>
    %12 = arith.truncf %11 : vector<16x32xf32> to vector<16x32xbf16>
    %c0_6 = arith.constant 0 : index
    %c0_7 = arith.constant 0 : index
    %13 = vector.load %arg8[%c0_6, %c0_7] : memref<4x32xf32, #tpu.memory_space<vmem>>, vector<4x32xf32>
    %14 = vector.extract_strided_slice %13 {offsets = [0, 0], sizes = [1, 32], strides = [1, 1]} : vector<4x32xf32> to vector<1x32xf32>
    %15 = vector.extract_strided_slice %13 {offsets = [1, 0], sizes = [1, 32], strides = [1, 1]} : vector<4x32xf32> to vector<1x32xf32>
    %16 = vector.extract_strided_slice %13 {offsets = [2, 0], sizes = [1, 32], strides = [1, 1]} : vector<4x32xf32> to vector<1x32xf32>
    %17 = vector.extract_strided_slice %13 {offsets = [3, 0], sizes = [1, 32], strides = [1, 1]} : vector<4x32xf32> to vector<1x32xf32>
    %18 = vector.extract_strided_slice %8 {offsets = [0, 0], sizes = [16, 8], strides = [1, 1]} : vector<16x32xbf16> to vector<16x8xbf16>
    %19 = vector.shape_cast %18 : vector<16x8xbf16> to vector<2x8x8xbf16>
    %20 = vector.extract_strided_slice %10 {offsets = [0, 0], sizes = [16, 8], strides = [1, 1]} : vector<16x32xbf16> to vector<16x8xbf16>
    %21 = vector.shape_cast %20 : vector<16x8xbf16> to vector<2x8x8xbf16>
    %22 = vector.extract_strided_slice %12 {offsets = [0, 0], sizes = [16, 8], strides = [1, 1]} : vector<16x32xbf16> to vector<16x8xbf16>
    %23 = vector.shape_cast %22 : vector<16x8xbf16> to vector<2x8x8xbf16>
    "tpu.trace_start"() <{level = 10 : i32, message = "bqd,bkd->bqk"}> : () -> ()
    %cst_8 = arith.constant dense<0.000000e+00> : vector<2x8x8xf32>
    %24 = tpu.matmul %19, %21, %cst_8 {dimension_numbers = #tpu.dot_dimension_numbers<[2], [2], [1], [1], [0, 0, 0, 1, 1, 1], [0], [0]>} : vector<2x8x8xbf16>, vector<2x8x8xbf16>, vector<2x8x8xf32> -> vector<2x8x8xf32>
    "tpu.trace_stop"() : () -> ()
    %cst_9 = arith.constant 0.353553385 : f32
    %25 = vector.broadcast %cst_9 : f32 to vector<2x8x8xf32>
    %26 = arith.mulf %24, %25 : vector<2x8x8xf32>
    %cst_10 = arith.constant dense<0xFF800000> : vector<2x8xf32>
    %27 = vector.multi_reduction <maximumf>, %26, %cst_10 [2] : vector<2x8x8xf32> to vector<2x8xf32>
    %28 = vector.shape_cast %27 : vector<2x8xf32> to vector<2x8x1xf32>
    %29 = vector.broadcast %28 : vector<2x8x1xf32> to vector<2x8x8xf32>
    %30 = arith.subf %26, %29 : vector<2x8x8xf32>
    %31 = math.exp %30 : vector<2x8x8xf32>
    %cst_11 = arith.constant dense<0.000000e+00> : vector<2x8xf32>
    %32 = vector.multi_reduction <add>, %31, %cst_11 [2] : vector<2x8x8xf32> to vector<2x8xf32>
    %33 = vector.shape_cast %32 : vector<2x8xf32> to vector<2x8x1xf32>
    %34 = tpu.reciprocal %33 {approx = true} : vector<2x8x1xf32> -> vector<2x8x1xf32>
    %35 = vector.broadcast %34 : vector<2x8x1xf32> to vector<2x8x8xf32>
    %36 = arith.mulf %31, %35 : vector<2x8x8xf32>
    %37 = arith.truncf %36 : vector<2x8x8xf32> to vector<2x8x8xbf16>
    "tpu.trace_start"() <{level = 10 : i32, message = "bqk,bkd->bqd"}> : () -> ()
    %cst_12 = arith.constant dense<0.000000e+00> : vector<2x8x8xf32>
    %38 = tpu.matmul %37, %23, %cst_12 {dimension_numbers = #tpu.dot_dimension_numbers<[2], [1], [1], [2], [0, 0, 0, 1, 1, 2], [0], [0]>} : vector<2x8x8xbf16>, vector<2x8x8xbf16>, vector<2x8x8xf32> -> vector<2x8x8xf32>
    "tpu.trace_stop"() : () -> ()
    %39 = vector.shape_cast %38 : vector<2x8x8xf32> to vector<16x8xf32>
    %40 = arith.truncf %39 : vector<16x8xf32> to vector<16x8xbf16>
    %41 = vector.extract_strided_slice %8 {offsets = [0, 8], sizes = [16, 8], strides = [1, 1]} : vector<16x32xbf16> to vector<16x8xbf16>
    %42 = vector.shape_cast %41 : vector<16x8xbf16> to vector<2x8x8xbf16>
    %43 = vector.extract_strided_slice %10 {offsets = [0, 8], sizes = [16, 8], strides = [1, 1]} : vector<16x32xbf16> to vector<16x8xbf16>
    %44 = vector.shape_cast %43 : vector<16x8xbf16> to vector<2x8x8xbf16>
    %45 = vector.extract_strided_slice %12 {offsets = [0, 8], sizes = [16, 8], strides = [1, 1]} : vector<16x32xbf16> to vector<16x8xbf16>
    %46 = vector.shape_cast %45 : vector<16x8xbf16> to vector<2x8x8xbf16>
    "tpu.trace_start"() <{level = 10 : i32, message = "bqd,bkd->bqk"}> : () -> ()
    %cst_13 = arith.constant dense<0.000000e+00> : vector<2x8x8xf32>
    %47 = tpu.matmul %42, %44, %cst_13 {dimension_numbers = #tpu.dot_dimension_numbers<[2], [2], [1], [1], [0, 0, 0, 1, 1, 1], [0], [0]>} : vector<2x8x8xbf16>, vector<2x8x8xbf16>, vector<2x8x8xf32> -> vector<2x8x8xf32>
    "tpu.trace_stop"() : () -> ()
    %cst_14 = arith.constant 0.353553385 : f32
    %48 = vector.broadcast %cst_14 : f32 to vector<2x8x8xf32>
    %49 = arith.mulf %47, %48 : vector<2x8x8xf32>
    %cst_15 = arith.constant dense<0xFF800000> : vector<2x8xf32>
    %50 = vector.multi_reduction <maximumf>, %49, %cst_15 [2] : vector<2x8x8xf32> to vector<2x8xf32>
    %51 = vector.shape_cast %50 : vector<2x8xf32> to vector<2x8x1xf32>
    %52 = vector.broadcast %51 : vector<2x8x1xf32> to vector<2x8x8xf32>
    %53 = arith.subf %49, %52 : vector<2x8x8xf32>
    %54 = math.exp %53 : vector<2x8x8xf32>
    %cst_16 = arith.constant dense<0.000000e+00> : vector<2x8xf32>
    %55 = vector.multi_reduction <add>, %54, %cst_16 [2] : vector<2x8x8xf32> to vector<2x8xf32>
    %56 = vector.shape_cast %55 : vector<2x8xf32> to vector<2x8x1xf32>
    %57 = tpu.reciprocal %56 {approx = true} : vector<2x8x1xf32> -> vector<2x8x1xf32>
    %58 = vector.broadcast %57 : vector<2x8x1xf32> to vector<2x8x8xf32>
    %59 = arith.mulf %54, %58 : vector<2x8x8xf32>
    %60 = arith.truncf %59 : vector<2x8x8xf32> to vector<2x8x8xbf16>
    "tpu.trace_start"() <{level = 10 : i32, message = "bqk,bkd->bqd"}> : () -> ()
    %cst_17 = arith.constant dense<0.000000e+00> : vector<2x8x8xf32>
    %61 = tpu.matmul %60, %46, %cst_17 {dimension_numbers = #tpu.dot_dimension_numbers<[2], [1], [1], [2], [0, 0, 0, 1, 1, 2], [0], [0]>} : vector<2x8x8xbf16>, vector<2x8x8xbf16>, vector<2x8x8xf32> -> vector<2x8x8xf32>
    "tpu.trace_stop"() : () -> ()
    %62 = vector.shape_cast %61 : vector<2x8x8xf32> to vector<16x8xf32>
    %63 = arith.truncf %62 : vector<16x8xf32> to vector<16x8xbf16>
    %64 = vector.extract_strided_slice %8 {offsets = [0, 16], sizes = [16, 8], strides = [1, 1]} : vector<16x32xbf16> to vector<16x8xbf16>
    %65 = vector.shape_cast %64 : vector<16x8xbf16> to vector<2x8x8xbf16>
    %66 = vector.extract_strided_slice %10 {offsets = [0, 16], sizes = [16, 8], strides = [1, 1]} : vector<16x32xbf16> to vector<16x8xbf16>
    %67 = vector.shape_cast %66 : vector<16x8xbf16> to vector<2x8x8xbf16>
    %68 = vector.extract_strided_slice %12 {offsets = [0, 16], sizes = [16, 8], strides = [1, 1]} : vector<16x32xbf16> to vector<16x8xbf16>
    %69 = vector.shape_cast %68 : vector<16x8xbf16> to vector<2x8x8xbf16>
    "tpu.trace_start"() <{level = 10 : i32, message = "bqd,bkd->bqk"}> : () -> ()
    %cst_18 = arith.constant dense<0.000000e+00> : vector<2x8x8xf32>
    %70 = tpu.matmul %65, %67, %cst_18 {dimension_numbers = #tpu.dot_dimension_numbers<[2], [2], [1], [1], [0, 0, 0, 1, 1, 1], [0], [0]>} : vector<2x8x8xbf16>, vector<2x8x8xbf16>, vector<2x8x8xf32> -> vector<2x8x8xf32>
    "tpu.trace_stop"() : () -> ()
    %cst_19 = arith.constant 0.353553385 : f32
    %71 = vector.broadcast %cst_19 : f32 to vector<2x8x8xf32>
    %72 = arith.mulf %70, %71 : vector<2x8x8xf32>
    %cst_20 = arith.constant dense<0xFF800000> : vector<2x8xf32>
    %73 = vector.multi_reduction <maximumf>, %72, %cst_20 [2] : vector<2x8x8xf32> to vector<2x8xf32>
    %74 = vector.shape_cast %73 : vector<2x8xf32> to vector<2x8x1xf32>
    %75 = vector.broadcast %74 : vector<2x8x1xf32> to vector<2x8x8xf32>
    %76 = arith.subf %72, %75 : vector<2x8x8xf32>
    %77 = math.exp %76 : vector<2x8x8xf32>
    %cst_21 = arith.constant dense<0.000000e+00> : vector<2x8xf32>
    %78 = vector.multi_reduction <add>, %77, %cst_21 [2] : vector<2x8x8xf32> to vector<2x8xf32>
    %79 = vector.shape_cast %78 : vector<2x8xf32> to vector<2x8x1xf32>
    %80 = tpu.reciprocal %79 {approx = true} : vector<2x8x1xf32> -> vector<2x8x1xf32>
    %81 = vector.broadcast %80 : vector<2x8x1xf32> to vector<2x8x8xf32>
    %82 = arith.mulf %77, %81 : vector<2x8x8xf32>
    %83 = arith.truncf %82 : vector<2x8x8xf32> to vector<2x8x8xbf16>
    "tpu.trace_start"() <{level = 10 : i32, message = "bqk,bkd->bqd"}> : () -> ()
    %cst_22 = arith.constant dense<0.000000e+00> : vector<2x8x8xf32>
    %84 = tpu.matmul %83, %69, %cst_22 {dimension_numbers = #tpu.dot_dimension_numbers<[2], [1], [1], [2], [0, 0, 0, 1, 1, 2], [0], [0]>} : vector<2x8x8xbf16>, vector<2x8x8xbf16>, vector<2x8x8xf32> -> vector<2x8x8xf32>
    "tpu.trace_stop"() : () -> ()
    %85 = vector.shape_cast %84 : vector<2x8x8xf32> to vector<16x8xf32>
    %86 = arith.truncf %85 : vector<16x8xf32> to vector<16x8xbf16>
    %87 = vector.extract_strided_slice %8 {offsets = [0, 24], sizes = [16, 8], strides = [1, 1]} : vector<16x32xbf16> to vector<16x8xbf16>
    %88 = vector.shape_cast %87 : vector<16x8xbf16> to vector<2x8x8xbf16>
    %89 = vector.extract_strided_slice %10 {offsets = [0, 24], sizes = [16, 8], strides = [1, 1]} : vector<16x32xbf16> to vector<16x8xbf16>
    %90 = vector.shape_cast %89 : vector<16x8xbf16> to vector<2x8x8xbf16>
    %91 = vector.extract_strided_slice %12 {offsets = [0, 24], sizes = [16, 8], strides = [1, 1]} : vector<16x32xbf16> to vector<16x8xbf16>
    %92 = vector.shape_cast %91 : vector<16x8xbf16> to vector<2x8x8xbf16>
    "tpu.trace_start"() <{level = 10 : i32, message = "bqd,bkd->bqk"}> : () -> ()
    %cst_23 = arith.constant dense<0.000000e+00> : vector<2x8x8xf32>
    %93 = tpu.matmul %88, %90, %cst_23 {dimension_numbers = #tpu.dot_dimension_numbers<[2], [2], [1], [1], [0, 0, 0, 1, 1, 1], [0], [0]>} : vector<2x8x8xbf16>, vector<2x8x8xbf16>, vector<2x8x8xf32> -> vector<2x8x8xf32>
    "tpu.trace_stop"() : () -> ()
    %cst_24 = arith.constant 0.353553385 : f32
    %94 = vector.broadcast %cst_24 : f32 to vector<2x8x8xf32>
    %95 = arith.mulf %93, %94 : vector<2x8x8xf32>
    %cst_25 = arith.constant dense<0xFF800000> : vector<2x8xf32>
    %96 = vector.multi_reduction <maximumf>, %95, %cst_25 [2] : vector<2x8x8xf32> to vector<2x8xf32>
    %97 = vector.shape_cast %96 : vector<2x8xf32> to vector<2x8x1xf32>
    %98 = vector.broadcast %97 : vector<2x8x1xf32> to vector<2x8x8xf32>
    %99 = arith.subf %95, %98 : vector<2x8x8xf32>
    %100 = math.exp %99 : vector<2x8x8xf32>
    %cst_26 = arith.constant dense<0.000000e+00> : vector<2x8xf32>
    %101 = vector.multi_reduction <add>, %100, %cst_26 [2] : vector<2x8x8xf32> to vector<2x8xf32>
    %102 = vector.shape_cast %101 : vector<2x8xf32> to vector<2x8x1xf32>
    %103 = tpu.reciprocal %102 {approx = true} : vector<2x8x1xf32> -> vector<2x8x1xf32>
    %104 = vector.broadcast %103 : vector<2x8x1xf32> to vector<2x8x8xf32>
    %105 = arith.mulf %100, %104 : vector<2x8x8xf32>
    %106 = arith.truncf %105 : vector<2x8x8xf32> to vector<2x8x8xbf16>
    "tpu.trace_start"() <{level = 10 : i32, message = "bqk,bkd->bqd"}> : () -> ()
    %cst_27 = arith.constant dense<0.000000e+00> : vector<2x8x8xf32>
    %107 = tpu.matmul %106, %92, %cst_27 {dimension_numbers = #tpu.dot_dimension_numbers<[2], [1], [1], [2], [0, 0, 0, 1, 1, 2], [0], [0]>} : vector<2x8x8xbf16>, vector<2x8x8xbf16>, vector<2x8x8xf32> -> vector<2x8x8xf32>
    "tpu.trace_stop"() : () -> ()
    %108 = vector.shape_cast %107 : vector<2x8x8xf32> to vector<16x8xf32>
    %109 = arith.truncf %108 : vector<16x8xf32> to vector<16x8xbf16>
    %110 = tpu.concatenate %40, %63, %86, %109 in 1 : vector<16x8xbf16>, vector<16x8xbf16>, vector<16x8xbf16>, vector<16x8xbf16> -> vector<16x32xbf16>
    %c0_28 = arith.constant 0 : index
    %c0_29 = arith.constant 0 : index
    %111 = vector.load %arg4[%c0_28, %c0_29] : memref<32x32xbf16, #tpu.memory_space<vmem>>, vector<32x32xbf16>
    %cst_30 = arith.constant dense<0.000000e+00> : vector<16x32xf32>
    %112 = tpu.matmul %110, %111, %cst_30 {dimension_numbers = #tpu.dot_dimension_numbers<[1], [0], [0], [1], [0, 0, 1, 1], [], []>} : vector<16x32xbf16>, vector<32x32xbf16>, vector<16x32xf32> -> vector<16x32xf32>
    %113 = vector.broadcast %14 : vector<1x32xf32> to vector<16x32xf32>
    %114 = arith.addf %112, %113 : vector<16x32xf32>
    %115 = arith.truncf %114 : vector<16x32xf32> to vector<16x32xbf16>
    %c0_31 = arith.constant 0 : index
    %c0_32 = arith.constant 0 : index
    %116 = vector.load %arg5[%c0_31, %c0_32] : memref<32x64xbf16, #tpu.memory_space<vmem>>, vector<32x64xbf16>
    %cst_33 = arith.constant dense<0.000000e+00> : vector<16x64xf32>
    %117 = tpu.matmul %115, %116, %cst_33 {dimension_numbers = #tpu.dot_dimension_numbers<[1], [0], [0], [1], [0, 0, 1, 1], [], []>} : vector<16x32xbf16>, vector<32x64xbf16>, vector<16x64xf32> -> vector<16x64xf32>
    %c0_34 = arith.constant 0 : index
    %c0_35 = arith.constant 0 : index
    %118 = vector.load %arg6[%c0_34, %c0_35] : memref<1x64xf32, #tpu.memory_space<vmem>>, vector<1x64xf32>
    %119 = vector.broadcast %118 : vector<1x64xf32> to vector<16x64xf32>
    %120 = arith.addf %117, %119 : vector<16x64xf32>
    %cst_36 = arith.constant 0.000000e+00 : f32
    %121 = vector.broadcast %cst_36 : f32 to vector<16x64xf32>
    %122 = arith.maximumf %120, %121 : vector<16x64xf32>
    %123 = arith.truncf %122 : vector<16x64xf32> to vector<16x64xbf16>
    %c0_37 = arith.constant 0 : index
    %c0_38 = arith.constant 0 : index
    %124 = vector.load %arg7[%c0_37, %c0_38] : memref<64x32xbf16, #tpu.memory_space<vmem>>, vector<64x32xbf16>
    %cst_39 = arith.constant dense<0.000000e+00> : vector<16x32xf32>
    %125 = tpu.matmul %123, %124, %cst_39 {dimension_numbers = #tpu.dot_dimension_numbers<[1], [0], [0], [1], [0, 0, 1, 1], [], []>} : vector<16x64xbf16>, vector<64x32xbf16>, vector<16x32xf32> -> vector<16x32xf32>
    %126 = vector.broadcast %15 : vector<1x32xf32> to vector<16x32xf32>
    %127 = arith.addf %125, %126 : vector<16x32xf32>
    %128 = arith.addf %127, %114 : vector<16x32xf32>
    %cst_40 = arith.constant dense<0.000000e+00> : vector<16xf32>
    %129 = vector.multi_reduction <add>, %128, %cst_40 [1] : vector<16x32xf32> to vector<16xf32>
    %130 = vector.shape_cast %129 : vector<16xf32> to vector<16x1xf32>
    %cst_41 = arith.constant 3.200000e+01 : f32
    %131 = vector.broadcast %cst_41 : f32 to vector<16x1xf32>
    %132 = arith.divf %130, %131 : vector<16x1xf32>
    %133 = vector.broadcast %132 : vector<16x1xf32> to vector<16x32xf32>
    %134 = arith.subf %128, %133 : vector<16x32xf32>
    %135 = arith.mulf %134, %134 : vector<16x32xf32>
    %cst_42 = arith.constant dense<0.000000e+00> : vector<16xf32>
    %136 = vector.multi_reduction <add>, %135, %cst_42 [1] : vector<16x32xf32> to vector<16xf32>
    %137 = vector.shape_cast %136 : vector<16xf32> to vector<16x1xf32>
    %cst_43 = arith.constant 3.200000e+01 : f32
    %138 = vector.broadcast %cst_43 : f32 to vector<16x1xf32>
    %139 = arith.divf %137, %138 : vector<16x1xf32>
    %140 = vector.broadcast %132 : vector<16x1xf32> to vector<16x32xf32>
    %141 = arith.subf %128, %140 : vector<16x32xf32>
    %cst_44 = arith.constant 9.99999997E-7 : f32
    %142 = vector.broadcast %cst_44 : f32 to vector<16x1xf32>
    %143 = arith.addf %139, %142 : vector<16x1xf32>
    %144 = math.rsqrt %143 : vector<16x1xf32>
    %145 = vector.broadcast %144 : vector<16x1xf32> to vector<16x32xf32>
    %146 = arith.mulf %141, %145 : vector<16x32xf32>
    %147 = vector.broadcast %16 : vector<1x32xf32> to vector<16x32xf32>
    %148 = arith.mulf %146, %147 : vector<16x32xf32>
    %149 = vector.broadcast %17 : vector<1x32xf32> to vector<16x32xf32>
    %150 = arith.addf %148, %149 : vector<16x32xf32>
    %151 = vector.shape_cast %150 : vector<16x32xf32> to vector<2x8x32xf32>
    %c0_45 = arith.constant 0 : index
    %c0_46 = arith.constant 0 : index
    %c0_47 = arith.constant 0 : index
    %152 = vector.load %arg9[%c0_45, %c0_46, %c0_47] : memref<2x8x32xf32, #tpu.memory_space<vmem>>, vector<2x8x32xf32>
    tpu.vector_store %arg9[%c0_45, %c0_46, %c0_47], %151 {strides = array<i32>} : memref<2x8x32xf32, #tpu.memory_space<vmem>>, vector<2x8x32xf32>,
    return
  }
  func.func @transform_0(%arg0: i32) -> (i32, i32, i32) {
    %c0_i32 = arith.constant 0 : i32
    %c0_i32_0 = arith.constant 0 : i32
    %c0_i32_1 = arith.constant 0 : i32
    return %arg0, %c0_i32, %c0_i32_0 : i32, i32, i32
  }
  func.func @transform_1(%arg0: i32) -> (i32, i32) {
    %c0_i32 = arith.constant 0 : i32
    %c0_i32_0 = arith.constant 0 : i32
    %c0_i32_1 = arith.constant 0 : i32
    return %c0_i32, %c0_i32_0 : i32, i32
  }
  func.func @transform_2(%arg0: i32) -> (i32, i32) {
    %c0_i32 = arith.constant 0 : i32
    %c0_i32_0 = arith.constant 0 : i32
    %c0_i32_1 = arith.constant 0 : i32
    return %c0_i32, %c0_i32_0 : i32, i32
  }
  func.func @transform_3(%arg0: i32) -> (i32, i32) {
    %c0_i32 = arith.constant 0 : i32
    %c0_i32_0 = arith.constant 0 : i32
    %c0_i32_1 = arith.constant 0 : i32
    return %c0_i32, %c0_i32_0 : i32, i32
  }
  func.func @transform_4(%arg0: i32) -> (i32, i32) {
    %c0_i32 = arith.constant 0 : i32
    %c0_i32_0 = arith.constant 0 : i32
    %c0_i32_1 = arith.constant 0 : i32
    return %c0_i32, %c0_i32_0 : i32, i32
  }
  func.func @transform_5(%arg0: i32) -> (i32, i32) {
    %c0_i32 = arith.constant 0 : i32
    %c0_i32_0 = arith.constant 0 : i32
    %c0_i32_1 = arith.constant 0 : i32
    return %c0_i32, %c0_i32_0 : i32, i32
  }
  func.func @transform_6(%arg0: i32) -> (i32, i32) {
    %c0_i32 = arith.constant 0 : i32
    %c0_i32_0 = arith.constant 0 : i32
    %c0_i32_1 = arith.constant 0 : i32
    return %c0_i32, %c0_i32_0 : i32, i32
  }
  func.func @transform_7(%arg0: i32) -> (i32, i32) {
    %c0_i32 = arith.constant 0 : i32
    %c0_i32_0 = arith.constant 0 : i32
    %c0_i32_1 = arith.constant 0 : i32
    return %c0_i32, %c0_i32_0 : i32, i32
  }
  func.func @transform_8(%arg0: i32) -> (i32, i32, i32) {
    %c0_i32 = arith.constant 0 : i32
    %c0_i32_0 = arith.constant 0 : i32
    %c0_i32_1 = arith.constant 0 : i32
    return %arg0, %c0_i32, %c0_i32_0 : i32, i32, i32
  }
}

</mosaic_0001>

<bundles_post_ra>
// kernel: tpu_custom_call.1
= control target key start
LH: loop header
LB: loop body
LE: loop exit
PB: predicated region body
PF: predicated region fallthrough
CT: control target
= control target key end

     0   :  { %13 = vsyncpa [#allocation3], 0  ;;  %s2304_s0 = inlined_call_operand.hbm [shape: bf16[2,8,32], index: 0, kind: input, shape index: {}]   ;;  %s2305_s1 = inlined_call_operand.hbm [shape: bf16[32,96], index: 1, kind: input, shape index: {}]   ;;  %s2306_s2 = inlined_call_operand.hbm [shape: f32[1,96], index: 2, kind: input, shape index: {}]   ;;  %s2307_s3 = inlined_call_operand.hbm [shape: bf16[32,32], index: 3, kind: input, shape index: {}]   ;;  %s2308_s4 = inlined_call_operand.hbm [shape: bf16[32,64], index: 4, kind: input, shape index: {}]   ;;  %s2309_s5 = inlined_call_operand.hbm [shape: f32[1,64], index: 5, kind: input, shape index: {}]   ;;  %s2310_s6 = inlined_call_operand.hbm [shape: bf16[64,32], index: 6, kind: input, shape index: {}]   ;;  %s2311_s7 = inlined_call_operand.hbm [shape: f32[4,32], index: 7, kind: input, shape index: {}]   ;;  %s2312_s8 = inlined_call_operand.hbm [shape: f32[2,8,32], index: 8, kind: output, shape index: {}]  }
   0x1   :  { %14 = vsyncpa [#allocation6], 0 }
   0x2   :  { %15 = vsyncpa [#allocation9], 0 }
   0x3   :  { %16 = vsyncpa [#allocation12], 0 }
   0x4   :  { %17 = vsyncpa [#allocation15], 0 }
   0x5   :  { %18 = vsyncpa [#allocation4], 0  ;;  %s1902_s27 = smov [#allocation5]   ;;  %s1903_s29 = smov [#allocation8]  }
   0x6   :  { %s36_s28 = sshll.u32 %s1902_s27, 4  ;;  %s58_s30 = sshll.u32 %s1903_s29, 4  ;;  %s37_s28 = int_to_ptr.vmem [resolvable:$true] %s36_s28  ;;  %s1974_s30 = int_to_ptr.vmem [resolvable:$true] %s58_s30 }
   0x7   :  { %s1692_s11 = scalar_lea.hbm %s2305_s1, 256 }
   0x8   :  { %p1693_p0 = scmp.ne.s32.totalorder %s2305_s1, %s1692_s11  ;;  %p1696_p1 = scmp.lt.u32.totalorder %s1692_s11, %s2305_s1 }
   0xa   :  { %p1698_p2 = pnand %p1696_p1, %p1693_p0 }
   0xc   :  { %1701 = shalt.err (!%p1698_p2)
}
   0xd   :  { %s1702_s16 = scalar_lea.vmem %s37_s28, 256  ;;  %p1707_p4 = scmp.lt.s32.totalorder %s37_s28, %s37_s28 }
   0xe   :  { %p1703_p3 = scmp.ne.s32.totalorder %s37_s28, %s1702_s16  ;;  %p1708_p5 = scmp.lt.s32.totalorder %s1702_s16, %s1702_s16 }
  0x10   :  { %p1709_p6 = por %p1708_p5, %p1707_p4 }
  0x12   :  { %p1710_p7 = pnand %p1709_p6, %p1703_p3 }
  0x14   :  { %1713 = shalt.err (!%p1710_p7)
}
  0x15   :  { %s1904_s17 = smov 64   ;;  %s1905_s18 = smov 4  }
  0x16   :  { %42 = dma.hbm_to_vmem [thread:$0]  %s2305_s1, 256, %s37_s28, [#allocation6], %s1904_s17, %s1904_s17, %s1905_s18  }
  0x17   :  { %s1714_s23 = scalar_lea.hbm %s2307_s3, 256 }
  0x18   :  { %p1715_p8 = scmp.ne.s32.totalorder %s2307_s3, %s1714_s23  ;;  %p1718_p9 = scmp.lt.u32.totalorder %s1714_s23, %s2307_s3 }
  0x1a   :  { %p1720_p10 = pnand %p1718_p9, %p1715_p8 }
  0x1c   :  { %1723 = shalt.err (!%p1720_p10)
}
  0x1d   :  { %s1724_s29 = scalar_lea.vmem %s1974_s30, 256  ;;  %p1729_p12 = scmp.lt.s32.totalorder %s1974_s30, %s1974_s30 }
  0x1e   :  { %p1725_p11 = scmp.ne.s32.totalorder %s1974_s30, %s1724_s29  ;;  %p1730_p13 = scmp.lt.s32.totalorder %s1724_s29, %s1724_s29 }
  0x20   :  { %p1731_p0 = por %p1730_p13, %p1729_p12 }
  0x22   :  { %p1732_p1 = pnand %p1731_p0, %p1725_p11 }
  0x24   :  { %1735 = shalt.err (!%p1732_p1)
}
  0x25   :  { %64 = dma.hbm_to_vmem [thread:$0]  %s2307_s3, 256, %s1974_s30, [#allocation9], %s1904_s17, %s1904_s17, %s1905_s18  }
  0x26   :  { %s1906_s9 = smov [#allocation11]   ;;  %s1907_s11 = smov [#allocation2]  }
  0x27   :  { %s83_s10 = sshll.u32 %s1906_s9, 4  ;;  %s24_s12 = sshll.u32 %s1907_s11, 4  ;;  %s84_s10 = int_to_ptr.vmem [resolvable:$true] %s83_s10  ;;  %s2011_s12 = int_to_ptr.vmem [resolvable:$true] %s24_s12 }
  0x28   :  { %s1736_s15 = scalar_lea.hbm %s2309_s5, 16 }
  0x29   :  { %p1737_p2 = scmp.ne.s32.totalorder %s2309_s5, %s1736_s15  ;;  %p1740_p3 = scmp.lt.u32.totalorder %s1736_s15, %s2309_s5 }
  0x2b   :  { %p1742_p4 = pnand %p1740_p3, %p1737_p2 }
  0x2d   :  { %1745 = shalt.err (!%p1742_p4)
}
  0x2e   :  { %s1746_s3 = scalar_lea.vmem %s84_s10, 16  ;;  %s1750_s30 = scalar_lea.vmem %s84_s10, 32 }
  0x2f   :  { %p1747_p5 = scmp.ne.s32.totalorder %s84_s10, %s1746_s3  ;;  %p1751_p6 = scmp.lt.s32.totalorder %s84_s10, %s84_s10 }
  0x30   :  { %p1752_p7 = scmp.lt.s32.totalorder %s1750_s30, %s1746_s3 }
  0x32   :  { %p1753_p8 = por %p1752_p7, %p1751_p6 }
  0x34   :  { %p1754_p9 = pnand %p1753_p8, %p1747_p5 }
  0x36   :  { %1757 = shalt.err (!%p1754_p9)
}
  0x37   :  { %86 = dma.hbm_to_vmem [thread:$0]  %s2309_s5, 16, %s84_s10, [#allocation12]  }
  0x38   :  { %s1758_s26 = scalar_lea.hbm %s2304_s0, 128 }
  0x39   :  { %p1759_p10 = scmp.ne.s32.totalorder %s2304_s0, %s1758_s26  ;;  %p1762_p11 = scmp.lt.u32.totalorder %s1758_s26, %s2304_s0 }
  0x3b   :  { %p1764_p12 = pnand %p1762_p11, %p1759_p10 }
  0x3d   :  { %1767 = shalt.err (!%p1764_p12)
}
  0x3e   :  { %s1768_s9 = scalar_lea.vmem %s2011_s12, 128  ;;  %p1773_p0 = scmp.lt.s32.totalorder %s2011_s12, %s2011_s12 }
  0x3f   :  { %p1769_p13 = scmp.ne.s32.totalorder %s2011_s12, %s1768_s9  ;;  %p1774_p1 = scmp.lt.s32.totalorder %s1768_s9, %s1768_s9 }
  0x41   :  { %p1775_p2 = por %p1774_p1, %p1773_p0 }
  0x43   :  { %p1776_p3 = pnand %p1775_p2, %p1769_p13 }
  0x45   :  { %1779 = shalt.err (!%p1776_p3)
}
  0x46   :  { %30 = dma.hbm_to_vmem [thread:$0]  %s2304_s0, 128, %s2011_s12, [#allocation3], %s1904_s17, %s1904_s17, %s1905_s18  }
  0x47   :  { %s1908_s11 = smov [#allocation7]   ;;  %s1909_s14 = smov [#allocation10]  }
  0x48   :  { %s49_s13 = sshll.u32 %s1908_s11, 4  ;;  %s70_s15 = sshll.u32 %s1909_s14, 4  ;;  %s50_s13 = int_to_ptr.vmem [resolvable:$true] %s49_s13  ;;  %s2045_s15 = int_to_ptr.vmem [resolvable:$true] %s70_s15 }
  0x49   :  { %s1780_s20 = scalar_lea.hbm %s2306_s2, 16 }
  0x4a   :  { %p1781_p4 = scmp.ne.s32.totalorder %s2306_s2, %s1780_s20  ;;  %p1784_p5 = scmp.lt.u32.totalorder %s1780_s20, %s2306_s2 }
  0x4c   :  { %p1786_p6 = pnand %p1784_p5, %p1781_p4 }
  0x4e   :  { %1789 = shalt.err (!%p1786_p6)
}
  0x4f   :  { %s1790_s0 = scalar_lea.vmem %s50_s13, 16  ;;  %s1794_s12 = scalar_lea.vmem %s50_s13, 32 }
  0x50   :  { %p1791_p7 = scmp.ne.s32.totalorder %s50_s13, %s1790_s0  ;;  %p1795_p8 = scmp.lt.s32.totalorder %s50_s13, %s50_s13 }
  0x51   :  { %p1796_p9 = scmp.lt.s32.totalorder %s1794_s12, %s1790_s0 }
  0x53   :  { %p1797_p10 = por %p1796_p9, %p1795_p8 }
  0x55   :  { %p1798_p11 = pnand %p1797_p10, %p1791_p7 }
  0x57   :  { %1801 = shalt.err (!%p1798_p11)
}
  0x58   :  { %52 = dma.hbm_to_vmem [thread:$0]  %s2306_s2, 16, %s50_s13, [#allocation6]  }
  0x59   :  { %s1802_s27 = scalar_lea.hbm %s2308_s4, 256 }
  0x5a   :  { %p1803_p12 = scmp.ne.s32.totalorder %s2308_s4, %s1802_s27  ;;  %p1806_p13 = scmp.lt.u32.totalorder %s1802_s27, %s2308_s4 }
  0x5c   :  { %p1808_p0 = pnand %p1806_p13, %p1803_p12 }
  0x5e   :  { %1811 = shalt.err (!%p1808_p0)
}
  0x5f   :  { %s1812_s5 = scalar_lea.vmem %s2045_s15, 256  ;;  %p1817_p2 = scmp.lt.s32.totalorder %s2045_s15, %s2045_s15 }
  0x60   :  { %p1813_p1 = scmp.ne.s32.totalorder %s2045_s15, %s1812_s5  ;;  %p1818_p3 = scmp.lt.s32.totalorder %s1812_s5, %s1812_s5 }
  0x62   :  { %p1819_p4 = por %p1818_p3, %p1817_p2 }
  0x64   :  { %p1820_p5 = pnand %p1819_p4, %p1813_p1 }
  0x66   :  { %1823 = shalt.err (!%p1820_p5)
}
  0x67   :  { %76 = dma.hbm_to_vmem [thread:$0]  %s2308_s4, 256, %s2045_s15, [#allocation9], %s1904_s17, %s1904_s17, %s1905_s18  }
  0x68   :  { %s1910_s11 = smov [#allocation13]   ;;  %s1911_s14 = smov [#allocation14]  }
  0x69   :  { %s92_s13 = sshll.u32 %s1910_s11, 4  ;;  %s105_s16 = sshll.u32 %s1911_s14, 4  ;;  %s93_s13 = int_to_ptr.vmem [resolvable:$true] %s92_s13  ;;  %s106_s16 = int_to_ptr.vmem [resolvable:$true] %s105_s16 }
  0x6a   :  { %s1824_s21 = scalar_lea.hbm %s2310_s6, 512 }
  0x6b   :  { %p1825_p6 = scmp.ne.s32.totalorder %s2310_s6, %s1824_s21  ;;  %p1828_p7 = scmp.lt.u32.totalorder %s1824_s21, %s2310_s6 }
  0x6d   :  { %p1830_p8 = pnand %p1828_p7, %p1825_p6 }
  0x6f   :  { %1833 = shalt.err (!%p1830_p8)
}
  0x70   :  { %s1834_s4 = scalar_lea.vmem %s93_s13, 512  ;;  %p1839_p10 = scmp.lt.s32.totalorder %s93_s13, %s93_s13 }
  0x71   :  { %p1835_p9 = scmp.ne.s32.totalorder %s93_s13, %s1834_s4  ;;  %p1840_p11 = scmp.lt.s32.totalorder %s1834_s4, %s1834_s4 }
  0x73   :  { %p1841_p12 = por %p1840_p11, %p1839_p10 }
  0x75   :  { %p1842_p13 = pnand %p1841_p12, %p1835_p9 }
  0x77   :  { %1845 = shalt.err (!%p1842_p13)
}
  0x78   :  { %98 = dma.hbm_to_vmem [thread:$0]  %s2310_s6, 512, %s93_s13, [#allocation12], %s1904_s17, %s1904_s17, %s1905_s18  }
  0x79   :  { %s1846_s25 = scalar_lea.hbm %s2311_s7, 64 }
  0x7a   :  { %p1847_p0 = scmp.ne.s32.totalorder %s2311_s7, %s1846_s25  ;;  %p1850_p1 = scmp.lt.u32.totalorder %s1846_s25, %s2311_s7 }
  0x7c   :  { %p1852_p2 = pnand %p1850_p1, %p1847_p0 }
  0x7e   :  { %1855 = shalt.err (!%p1852_p2)
}
  0x7f   :  { %s1856_s28 = scalar_lea.vmem %s106_s16, 64  ;;  %p1861_p4 = scmp.lt.s32.totalorder %s106_s16, %s106_s16 }
  0x80   :  { %p1857_p3 = scmp.ne.s32.totalorder %s106_s16, %s1856_s28  ;;  %p1862_p5 = scmp.lt.s32.totalorder %s1856_s28, %s1856_s28 }
  0x82   :  { %p1863_p6 = por %p1862_p5, %p1861_p4 }
  0x84   :  { %p1864_p7 = pnand %p1863_p6, %p1857_p3 }
  0x86   :  { %1867 = shalt.err (!%p1864_p7)
}
  0x87   :  { %108 = dma.hbm_to_vmem [thread:$0]  %s2311_s7, 64, %s106_s16, [#allocation15]  }
  0x88   :  { %1890 = dma.done.wait [#allocation3], 128  }
  0x89   :  { %1891 = vsyncadd [#allocation3], 4294967168 }
  0x8a   :  { %1892 = dma.done.wait [#allocation6], 272  }
  0x8b   :  { %1893 = vsyncadd [#allocation6], 4294967024 }
  0x8c   :  { %1894 = dma.done.wait [#allocation9], 512  }
  0x8d   :  { %1895 = vsyncadd [#allocation9], 4294966784 }
  0x8e   :  { %1896 = dma.done.wait [#allocation12], 528  }
  0x8f   :  { %1897 = vsyncadd [#allocation12], 4294966768 }
  0x90   :  { %1898 = dma.done.wait [#allocation15], 64  }
  0x91   :  { %1899 = vsyncadd [#allocation15], 4294967232  ;;  %v1912_v0 = vmov 0.0   ;;  %vm1913_vm0 = vmmov 0   ;;  %v1645_v1 = vld [vmem:[#allocation5] sm:$0xff]   ;;  %v1646_v2 = vld [vmem:[#allocation5 + $0x8] sm:$0xff]  }
  0x92   :  { %1486 = vmatprep.subr.bf16.mxu0 %v1912_v0  ;;  %1490 = vmatprep.mubr.msk.bf16.mxu0 %vm1913_vm0, %v1912_v0  ;;  %v1647_v3 = vld [vmem:[#allocation2] sm:$0xff]   ;;  %vm164_vm1 = vcmask 261120   ;;  %v1403_v4 = vld [vmem:[#allocation7] ss:$0 sm:$0xff]  ;;  %s1914_s7 = smov 96   ;;  %vm218_vm2 = vcmask 64512  }
  0x93   :  { %1494 = vmatprep.subr.bf16.mxu1 %v1912_v0  ;;  %1496 = vmatprep.mubr.msk.bf16.mxu1 %vm1913_vm0, %v1912_v0  ;;  %s1915_s9 = smov 88   ;;  %vm344_vm3 = vcmask 1043456   ;;  %s1917_s5 = smov 56   ;;  %vm1118_vm4 = vcmask 130048   ;;  %vm1121_vm5 = vcmask 195584   ;;  %vm1294_vm6 = vcmask 523264  }
  0x94   :  { %1487 = vmatpush3.bf16.msra.mxu0 %v1645_v1  ;;  %s1918_s2 = smov 80   ;;  %s1919_s10 = smov 112  }
  0x95   :  { %1488 = vmatprep.subr.bf16.mxu0 %v1912_v0  ;;  %s1920_s11 = smov 48   ;;  %s1921_s13 = smov 72  }
  0x96   :  { %s1922_s14 = smov 104   ;;  %s1923_s16 = smov 40  }
  0x97   :  { %s1924_s19 = smov 8   ;;  %s1925_s20 = smov 16  }
  0x98   :  { %1489 = vmatpush3.bf16.msra.mxu0 %v1646_v2  ;;  %s1926_s21 = smov 24   ;;  %s1927_s3 = smov [#allocation16]  }
  0x99   :  { %1500 = vmatprep.subr.bf16.mxu0 %v1912_v0  ;;  %s1387_s30 = sshll.u32 %s1927_s3, 4  ;;  %s1388_s30 = int_to_ptr.vmem [resolvable:$true] %s1387_s30 }
  0x9a   :  { %s1868_s22 = scalar_lea.vmem %s1388_s30, 256  ;;  %p1873_p9 = scmp.lt.s32.totalorder %s1388_s30, %s1388_s30 }
  0x9b   :  { %1491 = vmatmul.mubr.msk.bf16.vlgmr.msra.gmra.mrb[0].mxu0 %vm164_vm1, %v1647_v3  ;;  %p1869_p8 = scmp.ne.s32.totalorder %s1388_s30, %s1868_s22  ;;  %p1874_p10 = scmp.lt.s32.totalorder %s1868_s22, %s1868_s22 }
  0x9c   :  { %1502 = vmatprep.mubr.msk.bf16.mxu0 %vm1913_vm0, %v1912_v0 }
  0x9d   :  { %p1875_p11 = por %p1874_p10, %p1873_p9 }
  0x9f   :  { %p1876_p12 = pnand %p1875_p11, %p1869_p8 }
 0x16e   :  { %v202_v5 = vpop.f32.mrb[0].mxu0 }
 0x16f   :  { %v203_v6 = vadd.f32 %v1403_v4, %v202_v5  ;;  %v1492_v7 = vpop.f32.mrb[1].mxu0 }
 0x170   :  { %v205_v8 = vpop.f32.mrb[2].mxu0 }
 0x171   :  { %v2117_v9 = vpack.c.bf16 %v203_v6, %v203_v6  ;;  %v206_v10 = vadd.f32 %v1403_v4, %v205_v8  ;;  %v1493_v11 = vpop.f32.mrb[3].mxu0 }
 0x173   :  { %216 = vrot.lane.b32.xlu0 %v2117_v9, %s1914_s7  ;;  %v2120_v12 = vpack.c.bf16 %v206_v10, %v206_v10 }
 0x177   :  { %265 = vrot.lane.b32.xlu0 %v2120_v12, %s1914_s7 }
 0x1e5   :  { %v217_v13 = vpop.permute.xlu0 %216 }
 0x1e6   :  { %v223_v14 = vsel %vm218_vm2, %v217_v13, 0 }
 0x1e7   :  { %1495 = vmatpush3.bf16.xpose.msra.mxu1 %v223_v14 }
 0x1e8   :  { %1506 = vmatprep.subr.bf16.mxu1 %v1912_v0 }
 0x1e9   :  { %v266_v15 = vpop.permute.xlu0 %265 }
 0x1ea   :  { %v271_v16 = vsel %vm218_vm2, %v266_v15, 0 }
 0x1eb   :  { %1501 = vmatpush3.bf16.xpose.msra.mxu0 %v271_v16 }
 0x1ec   :  { %1512 = vmatprep.subr.bf16.mxu0 %v1912_v0 }
 0x1ee   :  { %1497 = vmatmul.mubr.msk.bf16.vlgmr.msra.gmra.mrb[0].mxu1 %vm218_vm2, %v2117_v9 }
 0x1ef   :  { %1508 = vmatprep.mubr.msk.bf16.mxu1 %vm1913_vm0, %v1912_v0 }
 0x1f2   :  { %1503 = vmatmul.mubr.msk.bf16.vlgmr.msra.gmra.mrb[4].mxu0 %vm218_vm2, %v2120_v12 }
 0x1f3   :  { %1514 = vmatprep.mubr.msk.bf16.mxu0 %vm1913_vm0, %v1912_v0 }
 0x2c1   :  { %v259_v17 = vpop.f32.mrb[0].mxu1 }
 0x2c2   :  { %v313_v18 = vmul.f32 0.35355338, %v259_v17  ;;  %v1498_v19 = vpop.f32.mrb[1].mxu1 }
 0x2c3   :  { %v262_v20 = vpop.f32.mrb[2].mxu1 }
 0x2c4   :  { %v1499_v21 = vpop.f32.mrb[3].mxu1  ;;  %v315_v22 = vsel %vm218_vm2, %v313_v18, -inf }
 0x2c5   :  { %316 = vmax.xlane.f32.xlu1 %v315_v22  ;;  %v307_v23 = vpop.f32.mrb[4].mxu0 }
 0x2c6   :  { %v314_v24 = vmul.f32 0.35355338, %v307_v23  ;;  %v1504_v25 = vpop.f32.mrb[5].mxu0 }
 0x2c7   :  { %v310_v26 = vpop.f32.mrb[6].mxu0 }
 0x2c8   :  { %v1505_v27 = vpop.f32.mrb[7].mxu0  ;;  %v318_v28 = vsel %vm218_vm2, %v314_v24, -inf }
 0x2c9   :  { %319 = vmax.xlane.f32.xlu1 %v318_v28 }
 0x2da   :  { %339 = vrot.lane.b32.xlu1 %v2117_v9, %s1904_s17 }
 0x2de   :  { %388 = vrot.lane.b32.xlu1 %v2120_v12, %s1904_s17  ;;  %s1916_s17 = smov 120  }
 0x2e2   :  { %439 = vrot.lane.b32.xlu1 %v2117_v9, %s1915_s9 }
 0x352   :  { %v317_v29 = vpop.xlane.xlu1 %316 }
 0x353   :  { %v321_v30 = vsub.f32 %v313_v18, %v317_v29 }
 0x355   :  { %v323_v31 = vmul.f32 1.442695, %v321_v30 }
 0x356   :  { %v320_v32 = vpop.xlane.xlu1 %319 }
 0x357   :  { %1656 = vpow2.f32 %v323_v31  ;;  %v322_v33 = vsub.f32 %v314_v24, %v320_v32 }
 0x359   :  { %v325_v34 = vmul.f32 1.442695, %v322_v33 }
 0x35a   :  { %v340_v35 = vpop.permute.xlu1 %339 }
 0x35b   :  { %1658 = vpow2.f32 %v325_v34  ;;  %v346_v36 = vsel %vm344_vm3, %v340_v35, 0 }
 0x35c   :  { %1507 = vmatpush3.bf16.msra.mxu1 %v346_v36 }
 0x35d   :  { %1518 = vmatprep.subr.bf16.mxu1 %v1912_v0 }
 0x35e   :  { %v389_v37 = vpop.permute.xlu1 %388 }
 0x35f   :  { %v394_v38 = vsel %vm344_vm3, %v389_v37, 0 }
 0x360   :  { %1513 = vmatpush3.bf16.msra.mxu0 %v394_v38 }
 0x361   :  { %v1657_v39 = vpop.eup %1656  ;;  %1524 = vmatprep.subr.bf16.mxu0 %v1912_v0 }
 0x362   :  { %v327_v40 = vsel %vm218_vm2, %v1657_v39, 0.0  ;;  %v440_v43 = vpop.permute.xlu1 %439 }
 0x363   :  { %328 = vadd.xlane.f32.xlu0 %v327_v40  ;;  %v445_v50 = vsel %vm218_vm2, %v440_v43, 0 }
 0x365   :  { %v1659_v41 = vpop.eup %1658 }
 0x366   :  { %v330_v42 = vsel %vm218_vm2, %v1659_v41, 0.0 }
 0x367   :  { %331 = vadd.xlane.f32.xlu1 %v330_v42 }
 0x378   :  { %489 = vrot.lane.b32.xlu1 %v2120_v12, %s1915_s9 }
 0x379   :  { %437 = vrot.lane.b32.xlu0 %v2117_v9, %s1916_s17 }
 0x37c   :  { %487 = vrot.lane.b32.xlu1 %v2120_v12, %s1916_s17 }
 0x3f0   :  { %v329_v44 = vpop.xlane.xlu0 %328 }
 0x3f1   :  { %1660 = vrcp.f32 %v329_v44 }
 0x3f4   :  { %v332_v45 = vpop.xlane.xlu1 %331  ;;  %v438_v55 = vpop.permute.xlu0 %437 }
 0x3f5   :  { %1662 = vrcp.f32 %v332_v45 }
 0x3f8   :  { %v490_v52 = vpop.permute.xlu1 %489 }
 0x3f9   :  { %v495_v54 = vsel %vm218_vm2, %v490_v52, 0 }
 0x3fb   :  { %v1661_v46 = vpop.eup %1660 }
 0x3fc   :  { %v335_v47 = vmul.f32 %v1661_v46, %v1657_v39  ;;  %v488_v56 = vpop.permute.xlu1 %487 }
 0x3fe   :  { %v337_v48 = vpack.c.bf16 %v335_v47, %v335_v47 }
 0x3ff   :  { %v1663_v49 = vpop.eup %1662 }
 0x400   :  { %v336_v51 = vmul.f32 %v1663_v49, %v1659_v41  ;;  %1509 = vmatmul.mubr.msk.bf16.vlgmr.msra.gmra.mrb[4].mxu1 %vm218_vm2, %v337_v48 }
 0x401   :  { %1519 = vmatpush3.bf16.xpose.msra.mxu1 %v445_v50  ;;  %1520 = vmatprep.mubr.msk.bf16.mxu1 %vm1913_vm0, %v1912_v0 }
 0x402   :  { %v338_v53 = vpack.c.bf16 %v336_v51, %v336_v51  ;;  %1530 = vmatprep.subr.bf16.mxu1 %v1912_v0 }
 0x404   :  { %1515 = vmatmul.mubr.msk.bf16.vlgmr.msra.gmra.mrb[8].mxu0 %vm218_vm2, %v338_v53 }
 0x405   :  { %1525 = vmatpush3.bf16.xpose.msra.mxu0 %v495_v54  ;;  %1526 = vmatprep.mubr.msk.bf16.mxu0 %vm1913_vm0, %v1912_v0 }
 0x406   :  { %1536 = vmatprep.subr.bf16.mxu0 %v1912_v0 }
 0x408   :  { %1521 = vmatmul.mubr.msk.bf16.vlgmr.msra.gmra.mrb[8].mxu1 %vm218_vm2, %v438_v55 }
 0x409   :  { %1532 = vmatprep.mubr.msk.bf16.mxu1 %vm1913_vm0, %v1912_v0 }
 0x40c   :  { %1527 = vmatmul.mubr.msk.bf16.vlgmr.msra.gmra.mrb[12].mxu0 %vm218_vm2, %v488_v56 }
 0x40d   :  { %1538 = vmatprep.mubr.msk.bf16.mxu0 %vm1913_vm0, %v1912_v0 }
 0x4d3   :  { %v2167_v57 = vpop.f32.mrb[4].mxu1 }
 0x4d4   :  { %v1510_v58 = vpop.f32.mrb[5].mxu1 }
 0x4d5   :  { %v385_v59 = vpop.f32.mrb[6].mxu1 }
 0x4d6   :  { %v1511_v60 = vpop.f32.mrb[7].mxu1 }
 0x4d7   :  { %v2169_v61 = vpop.f32.mrb[8].mxu0 }
 0x4d8   :  { %v436_v62 = vpack.c.bf16 %v2169_v61, %v2167_v57  ;;  %v1516_v63 = vpop.f32.mrb[9].mxu0  ;;  %v1128_v57 = vlaneseq }
 0x4d9   :  { %v433_v1 = vpop.f32.mrb[10].mxu0 }
 0x4da   :  { %v1517_v2 = vpop.f32.mrb[11].mxu0  ;;  %v2271_v61 = vshrl.u32 %v1128_v57, 7 }
 0x4db   :  { %v481_v3 = vpop.f32.mrb[8].mxu1 }
 0x4dc   :  { %v537_v4 = vmul.f32 0.35355338, %v481_v3  ;;  %v1522_v5 = vpop.f32.mrb[9].mxu1 }
 0x4dd   :  { %v484_v6 = vpop.f32.mrb[10].mxu1 }
 0x4de   :  { %v1523_v7 = vpop.f32.mrb[11].mxu1  ;;  %v539_v8 = vsel %vm218_vm2, %v537_v4, -inf }
 0x4df   :  { %540 = vmax.xlane.f32.xlu1 %v539_v8  ;;  %v531_v10 = vpop.f32.mrb[12].mxu0 }
 0x4e0   :  { %v538_v11 = vmul.f32 0.35355338, %v531_v10  ;;  %v1528_v13 = vpop.f32.mrb[13].mxu0 }
 0x4e1   :  { %v534_v14 = vpop.f32.mrb[14].mxu0 }
 0x4e2   :  { %v1529_v15 = vpop.f32.mrb[15].mxu0  ;;  %v542_v16 = vsel %vm218_vm2, %v538_v11, -inf }
 0x4e3   :  { %543 = vmax.xlane.f32.xlu0 %v542_v16 }
 0x4f0   :  { %563 = vrot.lane.b32.xlu1 %v2117_v9, %s1917_s5 }
 0x4f4   :  { %662 = vrot.lane.b32.xlu1 %v2117_v9, %s1918_s2 }
 0x4f9   :  { %611 = vrot.lane.b32.xlu0 %v2120_v12, %s1917_s5 }
 0x4fd   :  { %660 = vrot.lane.b32.xlu0 %v2117_v9, %s1919_s10 }
 0x56c   :  { %v541_v17 = vpop.xlane.xlu1 %540 }
 0x56d   :  { %v545_v18 = vsub.f32 %v537_v4, %v541_v17 }
 0x56f   :  { %v547_v19 = vmul.f32 1.442695, %v545_v18 }
 0x570   :  { %v564_v20 = vpop.permute.xlu1 %563  ;;  %v544_v21 = vpop.xlane.xlu0 %543 }
 0x571   :  { %1664 = vpow2.f32 %v547_v19  ;;  %v569_v22 = vsel %vm344_vm3, %v564_v20, 0  ;;  %v546_v23 = vsub.f32 %v538_v11, %v544_v21 }
 0x572   :  { %1531 = vmatpush3.bf16.msra.mxu1 %v569_v22 }
 0x573   :  { %v549_v24 = vmul.f32 1.442695, %v546_v23  ;;  %1542 = vmatprep.subr.bf16.mxu1 %v1912_v0 }
 0x574   :  { %v612_v25 = vpop.permute.xlu0 %611  ;;  %v663_v31 = vpop.permute.xlu1 %662 }
 0x575   :  { %1666 = vpow2.f32 %v549_v24  ;;  %v617_v26 = vsel %vm344_vm3, %v612_v25, 0  ;;  %v668_v38 = vsel %vm218_vm2, %v663_v31, 0 }
 0x576   :  { %1537 = vmatpush3.bf16.msra.mxu0 %v617_v26 }
 0x577   :  { %1548 = vmatprep.subr.bf16.mxu0 %v1912_v0 }
 0x578   :  { %v661_v43 = vpop.permute.xlu0 %660 }
 0x57b   :  { %v1665_v27 = vpop.eup %1664 }
 0x57c   :  { %v551_v28 = vsel %vm218_vm2, %v1665_v27, 0.0 }
 0x57d   :  { %552 = vadd.xlane.f32.xlu1 %v551_v28 }
 0x57f   :  { %v1667_v29 = vpop.eup %1666 }
 0x580   :  { %v554_v30 = vsel %vm218_vm2, %v1667_v29, 0.0 }
 0x581   :  { %555 = vadd.xlane.f32.xlu1 %v554_v30 }
 0x592   :  { %712 = vrot.lane.b32.xlu1 %v2120_v12, %s1918_s2 }
 0x596   :  { %710 = vrot.lane.b32.xlu1 %v2120_v12, %s1919_s10 }
 0x60a   :  { %v553_v32 = vpop.xlane.xlu1 %552 }
 0x60b   :  { %1668 = vrcp.f32 %v553_v32 }
 0x60e   :  { %v556_v33 = vpop.xlane.xlu1 %555 }
 0x60f   :  { %1670 = vrcp.f32 %v556_v33 }
 0x612   :  { %v713_v40 = vpop.permute.xlu1 %712 }
 0x613   :  { %v718_v42 = vsel %vm218_vm2, %v713_v40, 0 }
 0x615   :  { %v1669_v34 = vpop.eup %1668 }
 0x616   :  { %v559_v35 = vmul.f32 %v1669_v34, %v1665_v27  ;;  %v711_v44 = vpop.permute.xlu1 %710 }
 0x618   :  { %v561_v36 = vpack.c.bf16 %v559_v35, %v559_v35 }
 0x619   :  { %v1671_v37 = vpop.eup %1670 }
 0x61a   :  { %v560_v39 = vmul.f32 %v1671_v37, %v1667_v29  ;;  %1533 = vmatmul.mubr.msk.bf16.vlgmr.msra.gmra.mrb[12].mxu1 %vm218_vm2, %v561_v36 }
 0x61b   :  { %1543 = vmatpush3.bf16.xpose.msra.mxu1 %v668_v38  ;;  %1544 = vmatprep.mubr.msk.bf16.mxu1 %vm1913_vm0, %v1912_v0 }
 0x61c   :  { %v562_v41 = vpack.c.bf16 %v560_v39, %v560_v39  ;;  %1554 = vmatprep.subr.bf16.mxu1 %v1912_v0 }
 0x61e   :  { %1539 = vmatmul.mubr.msk.bf16.vlgmr.msra.gmra.mrb[16].mxu0 %vm218_vm2, %v562_v41 }
 0x61f   :  { %1549 = vmatpush3.bf16.xpose.msra.mxu0 %v718_v42  ;;  %1550 = vmatprep.mubr.msk.bf16.mxu0 %vm1913_vm0, %v1912_v0 }
 0x620   :  { %1560 = vmatprep.subr.bf16.mxu0 %v1912_v0 }
 0x622   :  { %1545 = vmatmul.mubr.msk.bf16.vlgmr.msra.gmra.mrb[16].mxu1 %vm218_vm2, %v661_v43 }
 0x623   :  { %1556 = vmatprep.mubr.msk.bf16.mxu1 %vm1913_vm0, %v1912_v0 }
 0x626   :  { %1551 = vmatmul.mubr.msk.bf16.vlgmr.msra.gmra.mrb[20].mxu0 %vm218_vm2, %v711_v44 }
 0x627   :  { %1562 = vmatprep.mubr.msk.bf16.mxu0 %vm1913_vm0, %v1912_v0 }
 0x6ed   :  { %v2203_v45 = vpop.f32.mrb[12].mxu1 }
 0x6ee   :  { %v1534_v46 = vpop.f32.mrb[13].mxu1 }
 0x6ef   :  { %v608_v47 = vpop.f32.mrb[14].mxu1 }
 0x6f0   :  { %v1535_v48 = vpop.f32.mrb[15].mxu1 }
 0x6f1   :  { %v2205_v49 = vpop.f32.mrb[16].mxu0 }
 0x6f2   :  { %v659_v50 = vpack.c.bf16 %v2205_v49, %v2203_v45  ;;  %v1540_v51 = vpop.f32.mrb[17].mxu0 }
 0x6f3   :  { %v656_v52 = vpop.f32.mrb[18].mxu0 }
 0x6f4   :  { %v1541_v53 = vpop.f32.mrb[19].mxu0 }
 0x6f5   :  { %v704_v54 = vpop.f32.mrb[16].mxu1 }
 0x6f6   :  { %v760_v55 = vmul.f32 0.35355338, %v704_v54  ;;  %v1546_v56 = vpop.f32.mrb[17].mxu1 }
 0x6f7   :  { %v707_v58 = vpop.f32.mrb[18].mxu1 }
 0x6f8   :  { %v1547_v59 = vpop.f32.mrb[19].mxu1  ;;  %v762_v60 = vsel %vm218_vm2, %v760_v55, -inf }
 0x6f9   :  { %763 = vmax.xlane.f32.xlu0 %v762_v60  ;;  %v754_v63 = vpop.f32.mrb[20].mxu0 }
 0x6fa   :  { %v761_v1 = vmul.f32 0.35355338, %v754_v63  ;;  %v1552_v2 = vpop.f32.mrb[21].mxu0 }
 0x6fb   :  { %v757_v3 = vpop.f32.mrb[22].mxu0 }
 0x6fc   :  { %v1553_v4 = vpop.f32.mrb[23].mxu0  ;;  %v765_v5 = vsel %vm218_vm2, %v761_v1, -inf }
 0x6fd   :  { %766 = vmax.xlane.f32.xlu1 %v765_v5 }
 0x70e   :  { %786 = vrot.lane.b32.xlu1 %v2117_v9, %s1920_s11 }
 0x712   :  { %885 = vrot.lane.b32.xlu1 %v2117_v9, %s1921_s13 }
 0x716   :  { %935 = vrot.lane.b32.xlu1 %v2120_v12, %s1921_s13 }
 0x71a   :  { %933 = vrot.lane.b32.xlu1 %v2120_v12, %s1922_s14 }
 0x786   :  { %v764_v6 = vpop.xlane.xlu0 %763 }
 0x787   :  { %v768_v7 = vsub.f32 %v760_v55, %v764_v6 }
 0x789   :  { %v770_v8 = vmul.f32 1.442695, %v768_v7 }
 0x78a   :  { %v767_v10 = vpop.xlane.xlu1 %766 }
 0x78b   :  { %1672 = vpow2.f32 %v770_v8  ;;  %v769_v11 = vsub.f32 %v761_v1, %v767_v10 }
 0x78d   :  { %v772_v13 = vmul.f32 1.442695, %v769_v11 }
 0x78e   :  { %v787_v14 = vpop.permute.xlu1 %786 }
 0x78f   :  { %1674 = vpow2.f32 %v772_v13  ;;  %v792_v15 = vsel %vm344_vm3, %v787_v14, 0 }
 0x790   :  { %1555 = vmatpush3.bf16.msra.mxu1 %v792_v15 }
 0x791   :  { %1566 = vmatprep.subr.bf16.mxu1 %v1912_v0 }
 0x792   :  { %v886_v25 = vpop.permute.xlu1 %885 }
 0x793   :  { %v891_v29 = vsel %vm218_vm2, %v886_v25, 0 }
 0x795   :  { %v1673_v16 = vpop.eup %1672 }
 0x796   :  { %v774_v17 = vsel %vm218_vm2, %v1673_v16, 0.0  ;;  %v936_v31 = vpop.permute.xlu1 %935 }
 0x797   :  { %775 = vadd.xlane.f32.xlu0 %v774_v17  ;;  %v941_v33 = vsel %vm218_vm2, %v936_v31, 0 }
 0x799   :  { %v1675_v18 = vpop.eup %1674 }
 0x79a   :  { %v777_v19 = vsel %vm218_vm2, %v1675_v18, 0.0  ;;  %v934_v35 = vpop.permute.xlu1 %933 }
 0x79b   :  { %778 = vadd.xlane.f32.xlu0 %v777_v19  ;;  %v1648_v19 = vld [vmem:[#allocation8] sm:$0xff]  }
 0x7b1   :  { %834 = vrot.lane.b32.xlu0 %v2120_v12, %s1920_s11 }
 0x7b5   :  { %883 = vrot.lane.b32.xlu0 %v2117_v9, %s1922_s14 }
 0x824   :  { %v776_v20 = vpop.xlane.xlu0 %775 }
 0x825   :  { %1676 = vrcp.f32 %v776_v20  ;;  %v1649_v20 = vld [vmem:[#allocation8 + $0x8] sm:$0xff]  }
 0x828   :  { %v779_v21 = vpop.xlane.xlu0 %778 }
 0x829   :  { %1678 = vrcp.f32 %v779_v21 }
 0x82c   :  { %v835_v22 = vpop.permute.xlu0 %834 }
 0x82d   :  { %v840_v23 = vsel %vm344_vm3, %v835_v22, 0 }
 0x82e   :  { %1561 = vmatpush3.bf16.msra.mxu0 %v840_v23 }
 0x82f   :  { %v1677_v24 = vpop.eup %1676  ;;  %1572 = vmatprep.subr.bf16.mxu0 %v1912_v0 }
 0x830   :  { %v782_v26 = vmul.f32 %v1677_v24, %v1673_v16  ;;  %v884_v34 = vpop.permute.xlu0 %883 }
 0x832   :  { %v784_v27 = vpack.c.bf16 %v782_v26, %v782_v26 }
 0x833   :  { %v1679_v28 = vpop.eup %1678 }
 0x834   :  { %v783_v30 = vmul.f32 %v1679_v28, %v1675_v18  ;;  %1557 = vmatmul.mubr.msk.bf16.vlgmr.msra.gmra.mrb[20].mxu1 %vm218_vm2, %v784_v27 }
 0x835   :  { %1567 = vmatpush3.bf16.xpose.msra.mxu1 %v891_v29  ;;  %1568 = vmatprep.mubr.msk.bf16.mxu1 %vm1913_vm0, %v1912_v0 }
 0x836   :  { %v785_v32 = vpack.c.bf16 %v783_v30, %v783_v30  ;;  %1578 = vmatprep.subr.bf16.mxu1 %v1912_v0 }
 0x838   :  { %1563 = vmatmul.mubr.msk.bf16.vlgmr.msra.gmra.mrb[24].mxu0 %vm218_vm2, %v785_v32 }
 0x839   :  { %1573 = vmatpush3.bf16.xpose.msra.mxu0 %v941_v33  ;;  %1574 = vmatprep.mubr.msk.bf16.mxu0 %vm1913_vm0, %v1912_v0 }
 0x83a   :  { %1584 = vmatprep.subr.bf16.mxu0 %v1912_v0 }
 0x83c   :  { %1569 = vmatmul.mubr.msk.bf16.vlgmr.msra.gmra.mrb[24].mxu1 %vm218_vm2, %v884_v34 }
 0x83d   :  { %1580 = vmatprep.mubr.msk.bf16.mxu1 %vm1913_vm0, %v1912_v0 }
 0x840   :  { %1575 = vmatmul.mubr.msk.bf16.vlgmr.msra.gmra.mrb[28].mxu0 %vm218_vm2, %v934_v35 }
 0x841   :  { %1586 = vmatprep.mubr.msk.bf16.mxu0 %vm1913_vm0, %v1912_v0 }
 0x907   :  { %v828_v36 = vpop.f32.mrb[20].mxu1 }
 0x908   :  { %v1558_v37 = vpop.f32.mrb[21].mxu1 }
 0x909   :  { %v831_v38 = vpop.f32.mrb[22].mxu1  ;;  %v1651_v37 = vld [vmem:[#allocation10 + $0x8] sm:$0xff]  }
 0x90a   :  { %v1559_v39 = vpop.f32.mrb[23].mxu1  ;;  %v1652_v38 = vld [vmem:[#allocation13] sm:$0xff]  }
 0x90b   :  { %v876_v40 = vpop.f32.mrb[24].mxu0  ;;  %v1653_v39 = vld [vmem:[#allocation13 + $0x8] sm:$0xff]  }
 0x90c   :  { %v882_v41 = vpack.c.bf16 %v876_v40, %v828_v36  ;;  %v1564_v42 = vpop.f32.mrb[25].mxu0  ;;  %v1650_v36 = vld [vmem:[#allocation10] sm:$0xff]   ;;  %v2274_v40 = vld [vmem:[#allocation14] sm:$0xf] }
 0x90d   :  { %v879_v43 = vpop.f32.mrb[26].mxu0 }
 0x90e   :  { %v1565_v44 = vpop.f32.mrb[27].mxu0 }
 0x90f   :  { %v927_v46 = vpop.f32.mrb[24].mxu1 }
 0x910   :  { %v983_v47 = vmul.f32 0.35355338, %v927_v46  ;;  %v1570_v48 = vpop.f32.mrb[25].mxu1 }
 0x911   :  { %v930_v51 = vpop.f32.mrb[26].mxu1 }
 0x912   :  { %v1571_v52 = vpop.f32.mrb[27].mxu1  ;;  %v985_v53 = vsel %vm218_vm2, %v983_v47, -inf }
 0x913   :  { %986 = vmax.xlane.f32.xlu0 %v985_v53  ;;  %v977_v54 = vpop.f32.mrb[28].mxu0  ;;  %v1654_v52 = vld [vmem:[#allocation13 + $0x10] sm:$0xff]   ;;  %v1655_v53 = vld [vmem:[#allocation13 + $0x18] sm:$0xff]  }
 0x914   :  { %v984_v55 = vmul.f32 0.35355338, %v977_v54  ;;  %v1576_v56 = vpop.f32.mrb[29].mxu0  ;;  %v1429_v54 = vld [vmem:[#allocation11] ss:$0 sm:$0xff] }
 0x915   :  { %v980_v58 = vpop.f32.mrb[30].mxu0 }
 0x916   :  { %v1577_v59 = vpop.f32.mrb[31].mxu0  ;;  %v988_v60 = vsel %vm218_vm2, %v984_v55, -inf }
 0x917   :  { %989 = vmax.xlane.f32.xlu1 %v988_v60 }
 0x928   :  { %1009 = vrot.lane.b32.xlu1 %v2117_v9, %s1923_s16 }
 0x92c   :  { %1107 = vrot.lane.b32.xlu1 %v659_v50, %s1924_s19 }
 0x930   :  { %1110 = vrot.lane.b32.xlu1 %v882_v41, %s1925_s20 }
 0x9a0   :  { %v987_v63 = vpop.xlane.xlu0 %986 }
 0x9a1   :  { %v991_v1 = vsub.f32 %v983_v47, %v987_v63 }
 0x9a3   :  { %v993_v2 = vmul.f32 1.442695, %v991_v1 }
 0x9a4   :  { %v990_v3 = vpop.xlane.xlu1 %989 }
 0x9a5   :  { %1680 = vpow2.f32 %v993_v2  ;;  %v992_v4 = vsub.f32 %v984_v55, %v990_v3 }
 0x9a7   :  { %v995_v5 = vmul.f32 1.442695, %v992_v4  ;;  %v1268_v4 = vsub.s32 1, %v2271_v61 }
 0x9a8   :  { %v1010_v6 = vpop.permute.xlu1 %1009 }
 0x9a9   :  { %1682 = vpow2.f32 %v995_v5  ;;  %v1015_v7 = vsel %vm344_vm3, %v1010_v6, 0  ;;  %v1269_v5 = vrot.slane %v2274_v40, %v1268_v4 }
 0x9aa   :  { %1579 = vmatpush3.bf16.msra.mxu1 %v1015_v7 }
 0x9ab   :  { %1590 = vmatprep.subr.bf16.mxu1 %v1912_v0 }
 0x9ac   :  { %v1108_v30 = vpop.permute.xlu1 %1107 }
 0x9ad   :  { %v1117_v32 = vsel %vm218_vm2, %v436_v62, %v1108_v30  ;;  %v1130_v62 = vsub.s32 0, %v2271_v61 }
 0x9af   :  { %v1681_v9 = vpop.eup %1680  ;;  %v1131_v41 = vrot.slane %v2274_v40, %v1130_v62 }
 0x9b0   :  { %v997_v45 = vsel %vm218_vm2, %v1681_v9, 0.0  ;;  %v1111_v31 = vpop.permute.xlu1 %1110 }
 0x9b1   :  { %998 = vadd.xlane.f32.xlu0 %v997_v45  ;;  %v1120_v33 = vsel %vm1118_vm4, %v1117_v32, %v1111_v31 }
 0x9b3   :  { %v1683_v49 = vpop.eup %1682 }
 0x9b4   :  { %v1000_v50 = vsel %vm218_vm2, %v1683_v49, 0.0 }
 0x9b5   :  { %1001 = vadd.xlane.f32.xlu0 %v1000_v50 }
 0x9cb   :  { %1057 = vrot.lane.b32.xlu0 %v2120_v12, %s1923_s16 }
 0xa3e   :  { %v999_v8 = vpop.xlane.xlu0 %998 }
 0xa3f   :  { %1684 = vrcp.f32 %v999_v8 }
 0xa42   :  { %v1002_v10 = vpop.xlane.xlu0 %1001 }
 0xa43   :  { %1686 = vrcp.f32 %v1002_v10 }
 0xa46   :  { %v1058_v11 = vpop.permute.xlu0 %1057 }
 0xa47   :  { %v1063_v13 = vsel %vm344_vm3, %v1058_v11, 0 }
 0xa48   :  { %1585 = vmatpush3.bf16.msra.mxu0 %v1063_v13 }
 0xa49   :  { %v1685_v14 = vpop.eup %1684  ;;  %1598 = vmatprep.subr.bf16.mxu0 %v1912_v0 }
 0xa4a   :  { %v1005_v15 = vmul.f32 %v1685_v14, %v1681_v9 }
 0xa4c   :  { %v1007_v16 = vpack.c.bf16 %v1005_v15, %v1005_v15 }
 0xa4d   :  { %v1687_v17 = vpop.eup %1686 }
 0xa4e   :  { %v1006_v18 = vmul.f32 %v1687_v17, %v1683_v49  ;;  %1581 = vmatmul.mubr.msk.bf16.vlgmr.msra.gmra.mrb[28].mxu1 %vm218_vm2, %v1007_v16 }
 0xa4f   :  { %1594 = vmatprep.mubr.msk.bf16.mxu1 %vm1913_vm0, %v1912_v0  ;;  %1591 = vmatpush3.bf16.msra.mxu1 %v1648_v19 }
 0xa50   :  { %v1008_v12 = vpack.c.bf16 %v1006_v18, %v1006_v18  ;;  %1592 = vmatprep.subr.bf16.mxu1 %v1912_v0 }
 0xa52   :  { %1587 = vmatmul.mubr.msk.bf16.vlgmr.msra.gmra.mrb[32].mxu0 %vm218_vm2, %v1008_v12 }
 0xa53   :  { %1602 = vmatprep.mubr.msk.bf16.mxu0 %vm1913_vm0, %v1912_v0  ;;  %1593 = vmatpush3.bf16.msra.mxu1 %v1649_v20 }
 0xa54   :  { %1606 = vmatprep.subr.bf16.mxu1 %v1912_v0  ;;  %1599 = vmatpush3.bf16.msra.mxu0 %v1650_v36 }
 0xa55   :  { %1600 = vmatprep.subr.bf16.mxu0 %v1912_v0 }
 0xa58   :  { %1601 = vmatpush3.bf16.msra.mxu0 %v1651_v37 }
 0xb21   :  { %v1051_v21 = vpop.f32.mrb[28].mxu1 }
 0xb22   :  { %v1582_v22 = vpop.f32.mrb[29].mxu1 }
 0xb23   :  { %v1054_v23 = vpop.f32.mrb[30].mxu1 }
 0xb24   :  { %v1583_v24 = vpop.f32.mrb[31].mxu1 }
 0xb25   :  { %v1099_v25 = vpop.f32.mrb[32].mxu0 }
 0xb26   :  { %v1105_v26 = vpack.c.bf16 %v1099_v25, %v1051_v21  ;;  %v1588_v27 = vpop.f32.mrb[33].mxu0 }
 0xb27   :  { %v1102_v28 = vpop.f32.mrb[34].mxu0 }
 0xb28   :  { %1113 = vrot.lane.b32.xlu0 %v1105_v26, %s1926_s21  ;;  %v1589_v29 = vpop.f32.mrb[35].mxu0  ;;  %v1370_v28 = vsub.s32 2, %v2271_v61 }
 0xb29   :  { %v1376_v29 = vsub.s32 3, %v2271_v61 }
 0xb2a   :  { %v1371_v30 = vrot.slane %v2274_v40, %v1370_v28 }
 0xb2b   :  { %v1377_v32 = vrot.slane %v2274_v40, %v1376_v29 }
 0xb9a   :  { %v1114_v34 = vpop.permute.xlu0 %1113 }
 0xb9b   :  { %v1123_v35 = vsel %vm1121_vm5, %v1120_v33, %v1114_v34 }
 0xb9c   :  { %1595 = vmatmul.mubr.msk.bf16.vlgmr.msra.gmra.mrb[32].mxu1 %vm164_vm1, %v1123_v35 }
 0xb9d   :  { %1614 = vmatprep.mubr.msk.bf16.mxu1 %vm1913_vm0, %v1912_v0  ;;  %1607 = vmatpush3.bf16.msra.mxu1 %v1652_v38 }
 0xb9e   :  { %1608 = vmatprep.subr.bf16.mxu1 %v1912_v0 }
 0xba1   :  { %1609 = vmatpush3.bf16.msra.mxu1 %v1653_v39 }
 0xba2   :  { %1610 = vmatprep.subr.bf16.mxu1 %v1912_v0 }
 0xba5   :  { %1611 = vmatpush3.bf16.msra.mxu1 %v1654_v52 }
 0xba6   :  { %1612 = vmatprep.subr.bf16.mxu1 %v1912_v0 }
 0xba9   :  { %1613 = vmatpush3.bf16.msra.mxu1 %v1655_v53 }
 0xc6f   :  { %v1180_v42 = vpop.f32.mrb[32].mxu1 }
 0xc70   :  { %v1596_v43 = vpop.f32.mrb[33].mxu1  ;;  %v1181_v46 = vadd.f32 %v1180_v42, %v1131_v41 }
 0xc71   :  { %v1183_v44 = vpop.f32.mrb[34].mxu1 }
 0xc72   :  { %v1184_v47 = vadd.f32 %v1183_v44, %v1131_v41  ;;  %v1597_v48 = vpop.f32.mrb[35].mxu1 }
 0xc74   :  { %v1187_v51 = vpack.c.bf16 %v1184_v47, %v1181_v46 }
 0xc76   :  { %1603 = vmatmul.mubr.msk.bf16.vlgmr.msra.gmra.mrb[36].mxu0 %vm164_vm1, %v1187_v51 }
 0xd49   :  { %v1248_v55 = vpop.f32.mrb[36].mxu0 }
 0xd4a   :  { %v1249_v56 = vadd.f32 %v1429_v54, %v1248_v55  ;;  %v1604_v58 = vpop.f32.mrb[37].mxu0 }
 0xd4b   :  { %v1251_v59 = vpop.f32.mrb[38].mxu0 }
 0xd4c   :  { %v1252_v60 = vadd.f32 %v1429_v54, %v1251_v59  ;;  %v1605_v63 = vpop.f32.mrb[39].mxu0  ;;  %v1255_v1 = vmax.f32 %v1249_v56, 0.0 }
 0xd4e   :  { %v1256_v2 = vmax.f32 %v1252_v60, 0.0 }
 0xd50   :  { %v1257_v3 = vpack.c.bf16 %v1256_v2, %v1255_v1 }
 0xd52   :  { %1615 = vmatmul.mubr.msk.bf16.vlgmr.msra.gmra.mrb[36].mxu1 %vm1294_vm6, %v1257_v3 }
 0xe25   :  { %v1332_v6 = vpop.f32.mrb[36].mxu1 }
 0xe26   :  { %v1333_v0 = vadd.f32 %v1332_v6, %v1269_v5  ;;  %v1616_v7 = vpop.f32.mrb[37].mxu1 }
 0xe27   :  { %v1335_v9 = vpop.f32.mrb[38].mxu1 }
 0xe28   :  { %v1336_v45 = vadd.f32 %v1335_v9, %v1269_v5  ;;  %v1617_v49 = vpop.f32.mrb[39].mxu1  ;;  %v1339_v50 = vadd.f32 %v1333_v0, %v1181_v46 }
 0xe2a   :  { %v1341_v8 = vsel %vm164_vm1, %v1339_v50, 0.0  ;;  %v1340_v10 = vadd.f32 %v1336_v45, %v1184_v47 }
 0xe2b   :  { %1342 = vadd.xlane.f32.xlu1 %v1341_v8 }
 0xe2c   :  { %v1344_v11 = vsel %vm164_vm1, %v1340_v10, 0.0 }
 0xe2d   :  { %1345 = vadd.xlane.f32.xlu0 %v1344_v11 }
 0xeb8   :  { %v1343_v13 = vpop.xlane.xlu1 %1342 }
 0xeb9   :  { %v1348_v14 = vmul.f32 0.03125, %v1343_v13 }
 0xeba   :  { %v1346_v15 = vpop.xlane.xlu0 %1345 }
 0xebb   :  { %v1350_v16 = vsub.f32 %v1339_v50, %v1348_v14  ;;  %v1349_v17 = vmul.f32 0.03125, %v1346_v15 }
 0xebd   :  { %v1351_v18 = vsub.f32 %v1340_v10, %v1349_v17  ;;  %v1352_v12 = vmul.f32 %v1350_v16, %v1350_v16 }
 0xebf   :  { %v1354_v19 = vsel %vm164_vm1, %v1352_v12, 0.0  ;;  %v1353_v20 = vmul.f32 %v1351_v18, %v1351_v18 }
 0xec0   :  { %1355 = vadd.xlane.f32.xlu0 %v1354_v19 }
 0xec1   :  { %v1357_v21 = vsel %vm164_vm1, %v1353_v20, 0.0 }
 0xec2   :  { %1358 = vadd.xlane.f32.xlu1 %v1357_v21 }
 0xf4d   :  { %v1356_v22 = vpop.xlane.xlu0 %1355 }
 0xf4e   :  { %v1360_v23 = vmul.f32 0.03125, %v1356_v22 }
 0xf4f   :  { %v1359_v24 = vpop.xlane.xlu1 %1358 }
 0xf50   :  { %v1362_v25 = vadd.f32 1e-06, %v1360_v23  ;;  %v1361_v26 = vmul.f32 0.03125, %v1359_v24 }
 0xf52   :  { %1688 = vrsqrt.f32 %v1362_v25  ;;  %v1363_v27 = vadd.f32 1e-06, %v1361_v26 }
 0xf54   :  { %1690 = vrsqrt.f32 %v1363_v27 }
 0xf5c   :  { %v1689_v31 = vpop.eup %1688 }
 0xf5d   :  { %v1366_v33 = vmul.f32 %v1689_v31, %v1350_v16 }
 0xf5e   :  { %v1691_v34 = vpop.eup %1690 }
 0xf5f   :  { %v1372_v35 = vmul.f32 %v1371_v30, %v1366_v33  ;;  %v1367_v36 = vmul.f32 %v1691_v34, %v1351_v18 }
 0xf61   :  { %v1373_v37 = vmul.f32 %v1371_v30, %v1367_v36  ;;  %v1378_v38 = vadd.f32 %v1377_v32, %v1372_v35 }
 0xf63   :  { %v1379_v39 = vadd.f32 %v1377_v32, %v1373_v37  ;;  %1380 = vst.msk [vmem:[#allocation16] sm:$0xff] %vm164_vm1, %v1378_v38 }
 0xf65   :  { %1381 = vst.msk [vmem:[#allocation16 + $0x8] sm:$0xff] %vm164_vm1, %v1379_v39 }
 0xf66   :  { %1879 = shalt.err (!%p1876_p12)
}
 0xf67   :  { %s1880_s15 = scalar_lea.hbm %s2312_s8, 256 }
 0xf68   :  { %p1881_p13 = scmp.ne.s32.totalorder %s2312_s8, %s1880_s15  ;;  %p1884_p0 = scmp.lt.u32.totalorder %s1880_s15, %s2312_s8 }
 0xf6a   :  { %p1886_p1 = pnand %p1884_p0, %p1881_p13 }
 0xf6c   :  { %1889 = shalt.err (!%p1886_p1)
}
 0xf6d   :  { %s1928_s26 = smov 128  }
 0xf6e   :  { %1393 = dma.vmem_to_hbm [thread:$0]  %s1388_s30, 256, %s2312_s8, [#allocation4], %s1928_s26, %s1928_s26, %s1924_s19  }
 0xf6f   :  { %1900 = dma.done.wait [#allocation4], 256  }
 0xf70   :  { %1901 = vsyncadd [#allocation4], 4294967040 }
 0xf71   :  { %1397 = vsyncpa [#allocation3], 1 }
 0xf72   :  { %1398 = vsyncpa [#allocation6], 1 }
 0xf73   :  { %1399 = vsyncpa [#allocation9], 1 }
 0xf74   :  { %1400 = vsyncpa [#allocation12], 1 }
 0xf75   :  { %1401 = vsyncpa [#allocation15], 1 }
 0xf76   :  { %1402 = vsyncpa [#allocation4], 1 }

// kernel: tpu_custom_call.1
= control target key start
LH: loop header
LB: loop body
LE: loop exit
PB: predicated region body
PF: predicated region fallthrough
CT: control target
= control target key end

     0   :  { %13 = vsyncpa [#allocation3], 0  ;;  %s2304_s0 = inlined_call_operand.hbm [shape: bf16[2,8,32], index: 0, kind: input, shape index: {}]   ;;  %s2305_s1 = inlined_call_operand.hbm [shape: bf16[32,96], index: 1, kind: input, shape index: {}]   ;;  %s2306_s2 = inlined_call_operand.hbm [shape: f32[1,96], index: 2, kind: input, shape index: {}]   ;;  %s2307_s3 = inlined_call_operand.hbm [shape: bf16[32,32], index: 3, kind: input, shape index: {}]   ;;  %s2308_s4 = inlined_call_operand.hbm [shape: bf16[32,64], index: 4, kind: input, shape index: {}]   ;;  %s2309_s5 = inlined_call_operand.hbm [shape: f32[1,64], index: 5, kind: input, shape index: {}]   ;;  %s2310_s6 = inlined_call_operand.hbm [shape: bf16[64,32], index: 6, kind: input, shape index: {}]   ;;  %s2311_s7 = inlined_call_operand.hbm [shape: f32[4,32], index: 7, kind: input, shape index: {}]   ;;  %s2312_s8 = inlined_call_operand.hbm [shape: f32[2,8,32], index: 8, kind: output, shape index: {}]  }
   0x1   :  { %14 = vsyncpa [#allocation6], 0 }
   0x2   :  { %15 = vsyncpa [#allocation9], 0 }
   0x3   :  { %16 = vsyncpa [#allocation12], 0 }
   0x4   :  { %17 = vsyncpa [#allocation15], 0 }
   0x5   :  { %18 = vsyncpa [#allocation4], 0  ;;  %s1902_s27 = smov [#allocation5]   ;;  %s1903_s29 = smov [#allocation8]  }
   0x6   :  { %s36_s28 = sshll.u32 %s1902_s27, 4  ;;  %s58_s30 = sshll.u32 %s1903_s29, 4  ;;  %s37_s28 = int_to_ptr.vmem [resolvable:$true] %s36_s28  ;;  %s1974_s30 = int_to_ptr.vmem [resolvable:$true] %s58_s30 }
   0x7   :  { %s1692_s11 = scalar_lea.hbm %s2305_s1, 256 }
   0x8   :  { %p1693_p0 = scmp.ne.s32.totalorder %s2305_s1, %s1692_s11  ;;  %p1696_p1 = scmp.lt.u32.totalorder %s1692_s11, %s2305_s1 }
   0xa   :  { %p1698_p2 = pnand %p1696_p1, %p1693_p0 }
   0xc   :  { %1701 = shalt.err (!%p1698_p2)
}
   0xd   :  { %s1702_s16 = scalar_lea.vmem %s37_s28, 256  ;;  %p1707_p4 = scmp.lt.s32.totalorder %s37_s28, %s37_s28 }
   0xe   :  { %p1703_p3 = scmp.ne.s32.totalorder %s37_s28, %s1702_s16  ;;  %p1708_p5 = scmp.lt.s32.totalorder %s1702_s16, %s1702_s16 }
  0x10   :  { %p1709_p6 = por %p1708_p5, %p1707_p4 }
  0x12   :  { %p1710_p7 = pnand %p1709_p6, %p1703_p3 }
  0x14   :  { %1713 = shalt.err (!%p1710_p7)
}
  0x15   :  { %s1904_s17 = smov 64   ;;  %s1905_s18 = smov 4  }
  0x16   :  { %42 = dma.hbm_to_vmem [thread:$0]  %s2305_s1, 256, %s37_s28, [#allocation6], %s1904_s17, %s1904_s17, %s1905_s18  }
  0x17   :  { %s1714_s23 = scalar_lea.hbm %s2307_s3, 256 }
  0x18   :  { %p1715_p8 = scmp.ne.s32.totalorder %s2307_s3, %s1714_s23  ;;  %p1718_p9 = scmp.lt.u32.totalorder %s1714_s23, %s2307_s3 }
  0x1a   :  { %p1720_p10 = pnand %p1718_p9, %p1715_p8 }
  0x1c   :  { %1723 = shalt.err (!%p1720_p10)
}
  0x1d   :  { %s1724_s29 = scalar_lea.vmem %s1974_s30, 256  ;;  %p1729_p12 = scmp.lt.s32.totalorder %s1974_s30, %s1974_s30 }
  0x1e   :  { %p1725_p11 = scmp.ne.s32.totalorder %s1974_s30, %s1724_s29  ;;  %p1730_p13 = scmp.lt.s32.totalorder %s1724_s29, %s1724_s29 }
  0x20   :  { %p1731_p0 = por %p1730_p13, %p1729_p12 }
  0x22   :  { %p1732_p1 = pnand %p1731_p0, %p1725_p11 }
  0x24   :  { %1735 = shalt.err (!%p1732_p1)
}
  0x25   :  { %64 = dma.hbm_to_vmem [thread:$0]  %s2307_s3, 256, %s1974_s30, [#allocation9], %s1904_s17, %s1904_s17, %s1905_s18  }
  0x26   :  { %s1906_s9 = smov [#allocation11]   ;;  %s1907_s11 = smov [#allocation2]  }
  0x27   :  { %s83_s10 = sshll.u32 %s1906_s9, 4  ;;  %s24_s12 = sshll.u32 %s1907_s11, 4  ;;  %s84_s10 = int_to_ptr.vmem [resolvable:$true] %s83_s10  ;;  %s2011_s12 = int_to_ptr.vmem [resolvable:$true] %s24_s12 }
  0x28   :  { %s1736_s15 = scalar_lea.hbm %s2309_s5, 16 }
  0x29   :  { %p1737_p2 = scmp.ne.s32.totalorder %s2309_s5, %s1736_s15  ;;  %p1740_p3 = scmp.lt.u32.totalorder %s1736_s15, %s2309_s5 }
  0x2b   :  { %p1742_p4 = pnand %p1740_p3, %p1737_p2 }
  0x2d   :  { %1745 = shalt.err (!%p1742_p4)
}
  0x2e   :  { %s1746_s3 = scalar_lea.vmem %s84_s10, 16  ;;  %s1750_s30 = scalar_lea.vmem %s84_s10, 32 }
  0x2f   :  { %p1747_p5 = scmp.ne.s32.totalorder %s84_s10, %s1746_s3  ;;  %p1751_p6 = scmp.lt.s32.totalorder %s84_s10, %s84_s10 }
  0x30   :  { %p1752_p7 = scmp.lt.s32.totalorder %s1750_s30, %s1746_s3 }
  0x32   :  { %p1753_p8 = por %p1752_p7, %p1751_p6 }
  0x34   :  { %p1754_p9 = pnand %p1753_p8, %p1747_p5 }
  0x36   :  { %1757 = shalt.err (!%p1754_p9)
}
  0x37   :  { %86 = dma.hbm_to_vmem [thread:$0]  %s2309_s5, 16, %s84_s10, [#allocation12]  }
  0x38   :  { %s1758_s26 = scalar_lea.hbm %s2304_s0, 128 }
  0x39   :  { %p1759_p10 = scmp.ne.s32.totalorder %s2304_s0, %s1758_s26  ;;  %p1762_p11 = scmp.lt.u32.totalorder %s1758_s26, %s2304_s0 }
  0x3b   :  { %p1764_p12 = pnand %p1762_p11, %p1759_p10 }
  0x3d   :  { %1767 = shalt.err (!%p1764_p12)
}
  0x3e   :  { %s1768_s9 = scalar_lea.vmem %s2011_s12, 128  ;;  %p1773_p0 = scmp.lt.s32.totalorder %s2011_s12, %s2011_s12 }
  0x3f   :  { %p1769_p13 = scmp.ne.s32.totalorder %s2011_s12, %s1768_s9  ;;  %p1774_p1 = scmp.lt.s32.totalorder %s1768_s9, %s1768_s9 }
  0x41   :  { %p1775_p2 = por %p1774_p1, %p1773_p0 }
  0x43   :  { %p1776_p3 = pnand %p1775_p2, %p1769_p13 }
  0x45   :  { %1779 = shalt.err (!%p1776_p3)
}
  0x46   :  { %30 = dma.hbm_to_vmem [thread:$0]  %s2304_s0, 128, %s2011_s12, [#allocation3], %s1904_s17, %s1904_s17, %s1905_s18  }
  0x47   :  { %s1908_s11 = smov [#allocation7]   ;;  %s1909_s14 = smov [#allocation10]  }
  0x48   :  { %s49_s13 = sshll.u32 %s1908_s11, 4  ;;  %s70_s15 = sshll.u32 %s1909_s14, 4  ;;  %s50_s13 = int_to_ptr.vmem [resolvable:$true] %s49_s13  ;;  %s2045_s15 = int_to_ptr.vmem [resolvable:$true] %s70_s15 }
  0x49   :  { %s1780_s20 = scalar_lea.hbm %s2306_s2, 16 }
  0x4a   :  { %p1781_p4 = scmp.ne.s32.totalorder %s2306_s2, %s1780_s20  ;;  %p1784_p5 = scmp.lt.u32.totalorder %s1780_s20, %s2306_s2 }
  0x4c   :  { %p1786_p6 = pnand %p1784_p5, %p1781_p4 }
  0x4e   :  { %1789 = shalt.err (!%p1786_p6)
}
  0x4f   :  { %s1790_s0 = scalar_lea.vmem %s50_s13, 16  ;;  %s1794_s12 = scalar_lea.vmem %s50_s13, 32 }
  0x50   :  { %p1791_p7 = scmp.ne.s32.totalorder %s50_s13, %s1790_s0  ;;  %p1795_p8 = scmp.lt.s32.totalorder %s50_s13, %s50_s13 }
  0x51   :  { %p1796_p9 = scmp.lt.s32.totalorder %s1794_s12, %s1790_s0 }
  0x53   :  { %p1797_p10 = por %p1796_p9, %p1795_p8 }
  0x55   :  { %p1798_p11 = pnand %p1797_p10, %p1791_p7 }
  0x57   :  { %1801 = shalt.err (!%p1798_p11)
}
  0x58   :  { %52 = dma.hbm_to_vmem [thread:$0]  %s2306_s2, 16, %s50_s13, [#allocation6]  }
  0x59   :  { %s1802_s27 = scalar_lea.hbm %s2308_s4, 256 }
  0x5a   :  { %p1803_p12 = scmp.ne.s32.totalorder %s2308_s4, %s1802_s27  ;;  %p1806_p13 = scmp.lt.u32.totalorder %s1802_s27, %s2308_s4 }
  0x5c   :  { %p1808_p0 = pnand %p1806_p13, %p1803_p12 }
  0x5e   :  { %1811 = shalt.err (!%p1808_p0)
}
  0x5f   :  { %s1812_s5 = scalar_lea.vmem %s2045_s15, 256  ;;  %p1817_p2 = scmp.lt.s32.totalorder %s2045_s15, %s2045_s15 }
  0x60   :  { %p1813_p1 = scmp.ne.s32.totalorder %s2045_s15, %s1812_s5  ;;  %p1818_p3 = scmp.lt.s32.totalorder %s1812_s5, %s1812_s5 }
  0x62   :  { %p1819_p4 = por %p1818_p3, %p1817_p2 }
  0x64   :  { %p1820_p5 = pnand %p1819_p4, %p1813_p1 }
  0x66   :  { %1823 = shalt.err (!%p1820_p5)
}
  0x67   :  { %76 = dma.hbm_to_vmem [thread:$0]  %s2308_s4, 256, %s2045_s15, [#allocation9], %s1904_s17, %s1904_s17, %s1905_s18  }
  0x68   :  { %s1910_s11 = smov [#allocation13]   ;;  %s1911_s14 = smov [#allocation14]  }
  0x69   :  { %s92_s13 = sshll.u32 %s1910_s11, 4  ;;  %s105_s16 = sshll.u32 %s1911_s14, 4  ;;  %s93_s13 = int_to_ptr.vmem [resolvable:$true] %s92_s13  ;;  %s106_s16 = int_to_ptr.vmem [resolvable:$true] %s105_s16 }
  0x6a   :  { %s1824_s21 = scalar_lea.hbm %s2310_s6, 512 }
  0x6b   :  { %p1825_p6 = scmp.ne.s32.totalorder %s2310_s6, %s1824_s21  ;;  %p1828_p7 = scmp.lt.u32.totalorder %s1824_s21, %s2310_s6 }
  0x6d   :  { %p1830_p8 = pnand %p1828_p7, %p1825_p6 }
  0x6f   :  { %1833 = shalt.err (!%p1830_p8)
}
  0x70   :  { %s1834_s4 = scalar_lea.vmem %s93_s13, 512  ;;  %p1839_p10 = scmp.lt.s32.totalorder %s93_s13, %s93_s13 }
  0x71   :  { %p1835_p9 = scmp.ne.s32.totalorder %s93_s13, %s1834_s4  ;;  %p1840_p11 = scmp.lt.s32.totalorder %s1834_s4, %s1834_s4 }
  0x73   :  { %p1841_p12 = por %p1840_p11, %p1839_p10 }
  0x75   :  { %p1842_p13 = pnand %p1841_p12, %p1835_p9 }
  0x77   :  { %1845 = shalt.err (!%p1842_p13)
}
  0x78   :  { %98 = dma.hbm_to_vmem [thread:$0]  %s2310_s6, 512, %s93_s13, [#allocation12], %s1904_s17, %s1904_s17, %s1905_s18  }
  0x79   :  { %s1846_s25 = scalar_lea.hbm %s2311_s7, 64 }
  0x7a   :  { %p1847_p0 = scmp.ne.s32.totalorder %s2311_s7, %s1846_s25  ;;  %p1850_p1 = scmp.lt.u32.totalorder %s1846_s25, %s2311_s7 }
  0x7c   :  { %p1852_p2 = pnand %p1850_p1, %p1847_p0 }
  0x7e   :  { %1855 = shalt.err (!%p1852_p2)
}
  0x7f   :  { %s1856_s28 = scalar_lea.vmem %s106_s16, 64  ;;  %p1861_p4 = scmp.lt.s32.totalorder %s106_s16, %s106_s16 }
  0x80   :  { %p1857_p3 = scmp.ne.s32.totalorder %s106_s16, %s1856_s28  ;;  %p1862_p5 = scmp.lt.s32.totalorder %s1856_s28, %s1856_s28 }
  0x82   :  { %p1863_p6 = por %p1862_p5, %p1861_p4 }
  0x84   :  { %p1864_p7 = pnand %p1863_p6, %p1857_p3 }
  0x86   :  { %1867 = shalt.err (!%p1864_p7)
}
  0x87   :  { %108 = dma.hbm_to_vmem [thread:$0]  %s2311_s7, 64, %s106_s16, [#allocation15]  }
  0x88   :  { %1890 = dma.done.wait [#allocation3], 128  }
  0x89   :  { %1891 = vsyncadd [#allocation3], 4294967168 }
  0x8a   :  { %1892 = dma.done.wait [#allocation6], 272  }
  0x8b   :  { %1893 = vsyncadd [#allocation6], 4294967024 }
  0x8c   :  { %1894 = dma.done.wait [#allocation9], 512  }
  0x8d   :  { %1895 = vsyncadd [#allocation9], 4294966784 }
  0x8e   :  { %1896 = dma.done.wait [#allocation12], 528  }
  0x8f   :  { %1897 = vsyncadd [#allocation12], 4294966768 }
  0x90   :  { %1898 = dma.done.wait [#allocation15], 64  }
  0x91   :  { %1899 = vsyncadd [#allocation15], 4294967232  ;;  %v1912_v0 = vmov 0.0   ;;  %vm1913_vm0 = vmmov 0   ;;  %v1645_v1 = vld [vmem:[#allocation5] sm:$0xff]   ;;  %v1646_v2 = vld [vmem:[#allocation5 + $0x8] sm:$0xff]  }
  0x92   :  { %1486 = vmatprep.subr.bf16.mxu0 %v1912_v0  ;;  %1490 = vmatprep.mubr.msk.bf16.mxu0 %vm1913_vm0, %v1912_v0  ;;  %v1647_v3 = vld [vmem:[#allocation2] sm:$0xff]   ;;  %vm164_vm1 = vcmask 261120   ;;  %v1403_v4 = vld [vmem:[#allocation7] ss:$0 sm:$0xff]  ;;  %s1914_s7 = smov 96   ;;  %vm218_vm2 = vcmask 64512  }
  0x93   :  { %1494 = vmatprep.subr.bf16.mxu1 %v1912_v0  ;;  %1496 = vmatprep.mubr.msk.bf16.mxu1 %vm1913_vm0, %v1912_v0  ;;  %s1915_s9 = smov 88   ;;  %vm344_vm3 = vcmask 1043456   ;;  %s1917_s5 = smov 56   ;;  %vm1118_vm4 = vcmask 130048   ;;  %vm1121_vm5 = vcmask 195584   ;;  %vm1294_vm6 = vcmask 523264  }
  0x94   :  { %1487 = vmatpush3.bf16.msra.mxu0 %v1645_v1  ;;  %s1918_s2 = smov 80   ;;  %s1919_s10 = smov 112  }
  0x95   :  { %1488 = vmatprep.subr.bf16.mxu0 %v1912_v0  ;;  %s1920_s11 = smov 48   ;;  %s1921_s13 = smov 72  }
  0x96   :  { %s1922_s14 = smov 104   ;;  %s1923_s16 = smov 40  }
  0x97   :  { %s1924_s19 = smov 8   ;;  %s1925_s20 = smov 16  }
  0x98   :  { %1489 = vmatpush3.bf16.msra.mxu0 %v1646_v2  ;;  %s1926_s21 = smov 24   ;;  %s1927_s3 = smov [#allocation16]  }
  0x99   :  { %1500 = vmatprep.subr.bf16.mxu0 %v1912_v0  ;;  %s1387_s30 = sshll.u32 %s1927_s3, 4  ;;  %s1388_s30 = int_to_ptr.vmem [resolvable:$true] %s1387_s30 }
  0x9a   :  { %s1868_s22 = scalar_lea.vmem %s1388_s30, 256  ;;  %p1873_p9 = scmp.lt.s32.totalorder %s1388_s30, %s1388_s30 }
  0x9b   :  { %1491 = vmatmul.mubr.msk.bf16.vlgmr.msra.gmra.mrb[0].mxu0 %vm164_vm1, %v1647_v3  ;;  %p1869_p8 = scmp.ne.s32.totalorder %s1388_s30, %s1868_s22  ;;  %p1874_p10 = scmp.lt.s32.totalorder %s1868_s22, %s1868_s22 }
  0x9c   :  { %1502 = vmatprep.mubr.msk.bf16.mxu0 %vm1913_vm0, %v1912_v0 }
  0x9d   :  { %p1875_p11 = por %p1874_p10, %p1873_p9 }
  0x9f   :  { %p1876_p12 = pnand %p1875_p11, %p1869_p8 }
 0x16e   :  { %v202_v5 = vpop.f32.mrb[0].mxu0 }
 0x16f   :  { %v203_v6 = vadd.f32 %v1403_v4, %v202_v5  ;;  %v1492_v7 = vpop.f32.mrb[1].mxu0 }
 0x170   :  { %v205_v8 = vpop.f32.mrb[2].mxu0 }
 0x171   :  { %v2117_v9 = vpack.c.bf16 %v203_v6, %v203_v6  ;;  %v206_v10 = vadd.f32 %v1403_v4, %v205_v8  ;;  %v1493_v11 = vpop.f32.mrb[3].mxu0 }
 0x173   :  { %216 = vrot.lane.b32.xlu0 %v2117_v9, %s1914_s7  ;;  %v2120_v12 = vpack.c.bf16 %v206_v10, %v206_v10 }
 0x177   :  { %265 = vrot.lane.b32.xlu0 %v2120_v12, %s1914_s7 }
 0x1e5   :  { %v217_v13 = vpop.permute.xlu0 %216 }
 0x1e6   :  { %v223_v14 = vsel %vm218_vm2, %v217_v13, 0 }
 0x1e7   :  { %1495 = vmatpush3.bf16.xpose.msra.mxu1 %v223_v14 }
 0x1e8   :  { %1506 = vmatprep.subr.bf16.mxu1 %v1912_v0 }
 0x1e9   :  { %v266_v15 = vpop.permute.xlu0 %265 }
 0x1ea   :  { %v271_v16 = vsel %vm218_vm2, %v266_v15, 0 }
 0x1eb   :  { %1501 = vmatpush3.bf16.xpose.msra.mxu0 %v271_v16 }
 0x1ec   :  { %1512 = vmatprep.subr.bf16.mxu0 %v1912_v0 }
 0x1ee   :  { %1497 = vmatmul.mubr.msk.bf16.vlgmr.msra.gmra.mrb[0].mxu1 %vm218_vm2, %v2117_v9 }
 0x1ef   :  { %1508 = vmatprep.mubr.msk.bf16.mxu1 %vm1913_vm0, %v1912_v0 }
 0x1f2   :  { %1503 = vmatmul.mubr.msk.bf16.vlgmr.msra.gmra.mrb[4].mxu0 %vm218_vm2, %v2120_v12 }
 0x1f3   :  { %1514 = vmatprep.mubr.msk.bf16.mxu0 %vm1913_vm0, %v1912_v0 }
 0x2c1   :  { %v259_v17 = vpop.f32.mrb[0].mxu1 }
 0x2c2   :  { %v313_v18 = vmul.f32 0.35355338, %v259_v17  ;;  %v1498_v19 = vpop.f32.mrb[1].mxu1 }
 0x2c3   :  { %v262_v20 = vpop.f32.mrb[2].mxu1 }
 0x2c4   :  { %v1499_v21 = vpop.f32.mrb[3].mxu1  ;;  %v315_v22 = vsel %vm218_vm2, %v313_v18, -inf }
 0x2c5   :  { %316 = vmax.xlane.f32.xlu1 %v315_v22  ;;  %v307_v23 = vpop.f32.mrb[4].mxu0 }
 0x2c6   :  { %v314_v24 = vmul.f32 0.35355338, %v307_v23  ;;  %v1504_v25 = vpop.f32.mrb[5].mxu0 }
 0x2c7   :  { %v310_v26 = vpop.f32.mrb[6].mxu0 }
 0x2c8   :  { %v1505_v27 = vpop.f32.mrb[7].mxu0  ;;  %v318_v28 = vsel %vm218_vm2, %v314_v24, -inf }
 0x2c9   :  { %319 = vmax.xlane.f32.xlu1 %v318_v28 }
 0x2da   :  { %339 = vrot.lane.b32.xlu1 %v2117_v9, %s1904_s17 }
 0x2de   :  { %388 = vrot.lane.b32.xlu1 %v2120_v12, %s1904_s17  ;;  %s1916_s17 = smov 120  }
 0x2e2   :  { %439 = vrot.lane.b32.xlu1 %v2117_v9, %s1915_s9 }
 0x352   :  { %v317_v29 = vpop.xlane.xlu1 %316 }
 0x353   :  { %v321_v30 = vsub.f32 %v313_v18, %v317_v29 }
 0x355   :  { %v323_v31 = vmul.f32 1.442695, %v321_v30 }
 0x356   :  { %v320_v32 = vpop.xlane.xlu1 %319 }
 0x357   :  { %1656 = vpow2.f32 %v323_v31  ;;  %v322_v33 = vsub.f32 %v314_v24, %v320_v32 }
 0x359   :  { %v325_v34 = vmul.f32 1.442695, %v322_v33 }
 0x35a   :  { %v340_v35 = vpop.permute.xlu1 %339 }
 0x35b   :  { %1658 = vpow2.f32 %v325_v34  ;;  %v346_v36 = vsel %vm344_vm3, %v340_v35, 0 }
 0x35c   :  { %1507 = vmatpush3.bf16.msra.mxu1 %v346_v36 }
 0x35d   :  { %1518 = vmatprep.subr.bf16.mxu1 %v1912_v0 }
 0x35e   :  { %v389_v37 = vpop.permute.xlu1 %388 }
 0x35f   :  { %v394_v38 = vsel %vm344_vm3, %v389_v37, 0 }
 0x360   :  { %1513 = vmatpush3.bf16.msra.mxu0 %v394_v38 }
 0x361   :  { %v1657_v39 = vpop.eup %1656  ;;  %1524 = vmatprep.subr.bf16.mxu0 %v1912_v0 }
 0x362   :  { %v327_v40 = vsel %vm218_vm2, %v1657_v39, 0.0  ;;  %v440_v43 = vpop.permute.xlu1 %439 }
 0x363   :  { %328 = vadd.xlane.f32.xlu0 %v327_v40  ;;  %v445_v50 = vsel %vm218_vm2, %v440_v43, 0 }
 0x365   :  { %v1659_v41 = vpop.eup %1658 }
 0x366   :  { %v330_v42 = vsel %vm218_vm2, %v1659_v41, 0.0 }
 0x367   :  { %331 = vadd.xlane.f32.xlu1 %v330_v42 }
 0x378   :  { %489 = vrot.lane.b32.xlu1 %v2120_v12, %s1915_s9 }
 0x379   :  { %437 = vrot.lane.b32.xlu0 %v2117_v9, %s1916_s17 }
 0x37c   :  { %487 = vrot.lane.b32.xlu1 %v2120_v12, %s1916_s17 }
 0x3f0   :  { %v329_v44 = vpop.xlane.xlu0 %328 }
 0x3f1   :  { %1660 = vrcp.f32 %v329_v44 }
 0x3f4   :  { %v332_v45 = vpop.xlane.xlu1 %331  ;;  %v438_v55 = vpop.permute.xlu0 %437 }
 0x3f5   :  { %1662 = vrcp.f32 %v332_v45 }
 0x3f8   :  { %v490_v52 = vpop.permute.xlu1 %489 }
 0x3f9   :  { %v495_v54 = vsel %vm218_vm2, %v490_v52, 0 }
 0x3fb   :  { %v1661_v46 = vpop.eup %1660 }
 0x3fc   :  { %v335_v47 = vmul.f32 %v1661_v46, %v1657_v39  ;;  %v488_v56 = vpop.permute.xlu1 %487 }
 0x3fe   :  { %v337_v48 = vpack.c.bf16 %v335_v47, %v335_v47 }
 0x3ff   :  { %v1663_v49 = vpop.eup %1662 }
 0x400   :  { %v336_v51 = vmul.f32 %v1663_v49, %v1659_v41  ;;  %1509 = vmatmul.mubr.msk.bf16.vlgmr.msra.gmra.mrb[4].mxu1 %vm218_vm2, %v337_v48 }
 0x401   :  { %1519 = vmatpush3.bf16.xpose.msra.mxu1 %v445_v50  ;;  %1520 = vmatprep.mubr.msk.bf16.mxu1 %vm1913_vm0, %v1912_v0 }
 0x402   :  { %v338_v53 = vpack.c.bf16 %v336_v51, %v336_v51  ;;  %1530 = vmatprep.subr.bf16.mxu1 %v1912_v0 }
 0x404   :  { %1515 = vmatmul.mubr.msk.bf16.vlgmr.msra.gmra.mrb[8].mxu0 %vm218_vm2, %v338_v53 }
 0x405   :  { %1525 = vmatpush3.bf16.xpose.msra.mxu0 %v495_v54  ;;  %1526 = vmatprep.mubr.msk.bf16.mxu0 %vm1913_vm0, %v1912_v0 }
 0x406   :  { %1536 = vmatprep.subr.bf16.mxu0 %v1912_v0 }
 0x408   :  { %1521 = vmatmul.mubr.msk.bf16.vlgmr.msra.gmra.mrb[8].mxu1 %vm218_vm2, %v438_v55 }
 0x409   :  { %1532 = vmatprep.mubr.msk.bf16.mxu1 %vm1913_vm0, %v1912_v0 }
 0x40c   :  { %1527 = vmatmul.mubr.msk.bf16.vlgmr.msra.gmra.mrb[12].mxu0 %vm218_vm2, %v488_v56 }
 0x40d   :  { %1538 = vmatprep.mubr.msk.bf16.mxu0 %vm1913_vm0, %v1912_v0 }
 0x4d3   :  { %v2167_v57 = vpop.f32.mrb[4].mxu1 }
 0x4d4   :  { %v1510_v58 = vpop.f32.mrb[5].mxu1 }
 0x4d5   :  { %v385_v59 = vpop.f32.mrb[6].mxu1 }
 0x4d6   :  { %v1511_v60 = vpop.f32.mrb[7].mxu1 }
 0x4d7   :  { %v2169_v61 = vpop.f32.mrb[8].mxu0 }
 0x4d8   :  { %v436_v62 = vpack.c.bf16 %v2169_v61, %v2167_v57  ;;  %v1516_v63 = vpop.f32.mrb[9].mxu0  ;;  %v1128_v57 = vlaneseq }
 0x4d9   :  { %v433_v1 = vpop.f32.mrb[10].mxu0 }
 0x4da   :  { %v1517_v2 = vpop.f32.mrb[11].mxu0  ;;  %v2271_v61 = vshrl.u32 %v1128_v57, 7 }
 0x4db   :  { %v481_v3 = vpop.f32.mrb[8].mxu1 }
 0x4dc   :  { %v537_v4 = vmul.f32 0.35355338, %v481_v3  ;;  %v1522_v5 = vpop.f32.mrb[9].mxu1 }
 0x4dd   :  { %v484_v6 = vpop.f32.mrb[10].mxu1 }
 0x4de   :  { %v1523_v7 = vpop.f32.mrb[11].mxu1  ;;  %v539_v8 = vsel %vm218_vm2, %v537_v4, -inf }
 0x4df   :  { %540 = vmax.xlane.f32.xlu1 %v539_v8  ;;  %v531_v10 = vpop.f32.mrb[12].mxu0 }
 0x4e0   :  { %v538_v11 = vmul.f32 0.35355338, %v531_v10  ;;  %v1528_v13 = vpop.f32.mrb[13].mxu0 }
 0x4e1   :  { %v534_v14 = vpop.f32.mrb[14].mxu0 }
 0x4e2   :  { %v1529_v15 = vpop.f32.mrb[15].mxu0  ;;  %v542_v16 = vsel %vm218_vm2, %v538_v11, -inf }
 0x4e3   :  { %543 = vmax.xlane.f32.xlu0 %v542_v16 }
 0x4f0   :  { %563 = vrot.lane.b32.xlu1 %v2117_v9, %s1917_s5 }
 0x4f4   :  { %662 = vrot.lane.b32.xlu1 %v2117_v9, %s1918_s2 }
 0x4f9   :  { %611 = vrot.lane.b32.xlu0 %v2120_v12, %s1917_s5 }
 0x4fd   :  { %660 = vrot.lane.b32.xlu0 %v2117_v9, %s1919_s10 }
 0x56c   :  { %v541_v17 = vpop.xlane.xlu1 %540 }
 0x56d   :  { %v545_v18 = vsub.f32 %v537_v4, %v541_v17 }
 0x56f   :  { %v547_v19 = vmul.f32 1.442695, %v545_v18 }
 0x570   :  { %v564_v20 = vpop.permute.xlu1 %563  ;;  %v544_v21 = vpop.xlane.xlu0 %543 }
 0x571   :  { %1664 = vpow2.f32 %v547_v19  ;;  %v569_v22 = vsel %vm344_vm3, %v564_v20, 0  ;;  %v546_v23 = vsub.f32 %v538_v11, %v544_v21 }
 0x572   :  { %1531 = vmatpush3.bf16.msra.mxu1 %v569_v22 }
 0x573   :  { %v549_v24 = vmul.f32 1.442695, %v546_v23  ;;  %1542 = vmatprep.subr.bf16.mxu1 %v1912_v0 }
 0x574   :  { %v612_v25 = vpop.permute.xlu0 %611  ;;  %v663_v31 = vpop.permute.xlu1 %662 }
 0x575   :  { %1666 = vpow2.f32 %v549_v24  ;;  %v617_v26 = vsel %vm344_vm3, %v612_v25, 0  ;;  %v668_v38 = vsel %vm218_vm2, %v663_v31, 0 }
 0x576   :  { %1537 = vmatpush3.bf16.msra.mxu0 %v617_v26 }
 0x577   :  { %1548 = vmatprep.subr.bf16.mxu0 %v1912_v0 }
 0x578   :  { %v661_v43 = vpop.permute.xlu0 %660 }
 0x57b   :  { %v1665_v27 = vpop.eup %1664 }
 0x57c   :  { %v551_v28 = vsel %vm218_vm2, %v1665_v27, 0.0 }
 0x57d   :  { %552 = vadd.xlane.f32.xlu1 %v551_v28 }
 0x57f   :  { %v1667_v29 = vpop.eup %1666 }
 0x580   :  { %v554_v30 = vsel %vm218_vm2, %v1667_v29, 0.0 }
 0x581   :  { %555 = vadd.xlane.f32.xlu1 %v554_v30 }
 0x592   :  { %712 = vrot.lane.b32.xlu1 %v2120_v12, %s1918_s2 }
 0x596   :  { %710 = vrot.lane.b32.xlu1 %v2120_v12, %s1919_s10 }
 0x60a   :  { %v553_v32 = vpop.xlane.xlu1 %552 }
 0x60b   :  { %1668 = vrcp.f32 %v553_v32 }
 0x60e   :  { %v556_v33 = vpop.xlane.xlu1 %555 }
 0x60f   :  { %1670 = vrcp.f32 %v556_v33 }
 0x612   :  { %v713_v40 = vpop.permute.xlu1 %712 }
 0x613   :  { %v718_v42 = vsel %vm218_vm2, %v713_v40, 0 }
 0x615   :  { %v1669_v34 = vpop.eup %1668 }
 0x616   :  { %v559_v35 = vmul.f32 %v1669_v34, %v1665_v27  ;;  %v711_v44 = vpop.permute.xlu1 %710 }
 0x618   :  { %v561_v36 = vpack.c.bf16 %v559_v35, %v559_v35 }
 0x619   :  { %v1671_v37 = vpop.eup %1670 }
 0x61a   :  { %v560_v39 = vmul.f32 %v1671_v37, %v1667_v29  ;;  %1533 = vmatmul.mubr.msk.bf16.vlgmr.msra.gmra.mrb[12].mxu1 %vm218_vm2, %v561_v36 }
 0x61b   :  { %1543 = vmatpush3.bf16.xpose.msra.mxu1 %v668_v38  ;;  %1544 = vmatprep.mubr.msk.bf16.mxu1 %vm1913_vm0, %v1912_v0 }
 0x61c   :  { %v562_v41 = vpack.c.bf16 %v560_v39, %v560_v39  ;;  %1554 = vmatprep.subr.bf16.mxu1 %v1912_v0 }
 0x61e   :  { %1539 = vmatmul.mubr.msk.bf16.vlgmr.msra.gmra.mrb[16].mxu0 %vm218_vm2, %v562_v41 }
 0x61f   :  { %1549 = vmatpush3.bf16.xpose.msra.mxu0 %v718_v42  ;;  %1550 = vmatprep.mubr.msk.bf16.mxu0 %vm1913_vm0, %v1912_v0 }
 0x620   :  { %1560 = vmatprep.subr.bf16.mxu0 %v1912_v0 }
 0x622   :  { %1545 = vmatmul.mubr.msk.bf16.vlgmr.msra.gmra.mrb[16].mxu1 %vm218_vm2, %v661_v43 }
 0x623   :  { %1556 = vmatprep.mubr.msk.bf16.mxu1 %vm1913_vm0, %v1912_v0 }
 0x626   :  { %1551 = vmatmul.mubr.msk.bf16.vlgmr.msra.gmra.mrb[20].mxu0 %vm218_vm2, %v711_v44 }
 0x627   :  { %1562 = vmatprep.mubr.msk.bf16.mxu0 %vm1913_vm0, %v1912_v0 }
 0x6ed   :  { %v2203_v45 = vpop.f32.mrb[12].mxu1 }
 0x6ee   :  { %v1534_v46 = vpop.f32.mrb[13].mxu1 }
 0x6ef   :  { %v608_v47 = vpop.f32.mrb[14].mxu1 }
 0x6f0   :  { %v1535_v48 = vpop.f32.mrb[15].mxu1 }
 0x6f1   :  { %v2205_v49 = vpop.f32.mrb[16].mxu0 }
 0x6f2   :  { %v659_v50 = vpack.c.bf16 %v2205_v49, %v2203_v45  ;;  %v1540_v51 = vpop.f32.mrb[17].mxu0 }
 0x6f3   :  { %v656_v52 = vpop.f32.mrb[18].mxu0 }
 0x6f4   :  { %v1541_v53 = vpop.f32.mrb[19].mxu0 }
 0x6f5   :  { %v704_v54 = vpop.f32.mrb[16].mxu1 }
 0x6f6   :  { %v760_v55 = vmul.f32 0.35355338, %v704_v54  ;;  %v1546_v56 = vpop.f32.mrb[17].mxu1 }
 0x6f7   :  { %v707_v58 = vpop.f32.mrb[18].mxu1 }
 0x6f8   :  { %v1547_v59 = vpop.f32.mrb[19].mxu1  ;;  %v762_v60 = vsel %vm218_vm2, %v760_v55, -inf }
 0x6f9   :  { %763 = vmax.xlane.f32.xlu0 %v762_v60  ;;  %v754_v63 = vpop.f32.mrb[20].mxu0 }
 0x6fa   :  { %v761_v1 = vmul.f32 0.35355338, %v754_v63  ;;  %v1552_v2 = vpop.f32.mrb[21].mxu0 }
 0x6fb   :  { %v757_v3 = vpop.f32.mrb[22].mxu0 }
 0x6fc   :  { %v1553_v4 = vpop.f32.mrb[23].mxu0  ;;  %v765_v5 = vsel %vm218_vm2, %v761_v1, -inf }
 0x6fd   :  { %766 = vmax.xlane.f32.xlu1 %v765_v5 }
 0x70e   :  { %786 = vrot.lane.b32.xlu1 %v2117_v9, %s1920_s11 }
 0x712   :  { %885 = vrot.lane.b32.xlu1 %v2117_v9, %s1921_s13 }
 0x716   :  { %935 = vrot.lane.b32.xlu1 %v2120_v12, %s1921_s13 }
 0x71a   :  { %933 = vrot.lane.b32.xlu1 %v2120_v12, %s1922_s14 }
 0x786   :  { %v764_v6 = vpop.xlane.xlu0 %763 }
 0x787   :  { %v768_v7 = vsub.f32 %v760_v55, %v764_v6 }
 0x789   :  { %v770_v8 = vmul.f32 1.442695, %v768_v7 }
 0x78a   :  { %v767_v10 = vpop.xlane.xlu1 %766 }
 0x78b   :  { %1672 = vpow2.f32 %v770_v8  ;;  %v769_v11 = vsub.f32 %v761_v1, %v767_v10 }
 0x78d   :  { %v772_v13 = vmul.f32 1.442695, %v769_v11 }
 0x78e   :  { %v787_v14 = vpop.permute.xlu1 %786 }
 0x78f   :  { %1674 = vpow2.f32 %v772_v13  ;;  %v792_v15 = vsel %vm344_vm3, %v787_v14, 0 }
 0x790   :  { %1555 = vmatpush3.bf16.msra.mxu1 %v792_v15 }
 0x791   :  { %1566 = vmatprep.subr.bf16.mxu1 %v1912_v0 }
 0x792   :  { %v886_v25 = vpop.permute.xlu1 %885 }
 0x793   :  { %v891_v29 = vsel %vm218_vm2, %v886_v25, 0 }
 0x795   :  { %v1673_v16 = vpop.eup %1672 }
 0x796   :  { %v774_v17 = vsel %vm218_vm2, %v1673_v16, 0.0  ;;  %v936_v31 = vpop.permute.xlu1 %935 }
 0x797   :  { %775 = vadd.xlane.f32.xlu0 %v774_v17  ;;  %v941_v33 = vsel %vm218_vm2, %v936_v31, 0 }
 0x799   :  { %v1675_v18 = vpop.eup %1674 }
 0x79a   :  { %v777_v19 = vsel %vm218_vm2, %v1675_v18, 0.0  ;;  %v934_v35 = vpop.permute.xlu1 %933 }
 0x79b   :  { %778 = vadd.xlane.f32.xlu0 %v777_v19  ;;  %v1648_v19 = vld [vmem:[#allocation8] sm:$0xff]  }
 0x7b1   :  { %834 = vrot.lane.b32.xlu0 %v2120_v12, %s1920_s11 }
 0x7b5   :  { %883 = vrot.lane.b32.xlu0 %v2117_v9, %s1922_s14 }
 0x824   :  { %v776_v20 = vpop.xlane.xlu0 %775 }
 0x825   :  { %1676 = vrcp.f32 %v776_v20  ;;  %v1649_v20 = vld [vmem:[#allocation8 + $0x8] sm:$0xff]  }
 0x828   :  { %v779_v21 = vpop.xlane.xlu0 %778 }
 0x829   :  { %1678 = vrcp.f32 %v779_v21 }
 0x82c   :  { %v835_v22 = vpop.permute.xlu0 %834 }
 0x82d   :  { %v840_v23 = vsel %vm344_vm3, %v835_v22, 0 }
 0x82e   :  { %1561 = vmatpush3.bf16.msra.mxu0 %v840_v23 }
 0x82f   :  { %v1677_v24 = vpop.eup %1676  ;;  %1572 = vmatprep.subr.bf16.mxu0 %v1912_v0 }
 0x830   :  { %v782_v26 = vmul.f32 %v1677_v24, %v1673_v16  ;;  %v884_v34 = vpop.permute.xlu0 %883 }
 0x832   :  { %v784_v27 = vpack.c.bf16 %v782_v26, %v782_v26 }
 0x833   :  { %v1679_v28 = vpop.eup %1678 }
 0x834   :  { %v783_v30 = vmul.f32 %v1679_v28, %v1675_v18  ;;  %1557 = vmatmul.mubr.msk.bf16.vlgmr.msra.gmra.mrb[20].mxu1 %vm218_vm2, %v784_v27 }
 0x835   :  { %1567 = vmatpush3.bf16.xpose.msra.mxu1 %v891_v29  ;;  %1568 = vmatprep.mubr.msk.bf16.mxu1 %vm1913_vm0, %v1912_v0 }
 0x836   :  { %v785_v32 = vpack.c.bf16 %v783_v30, %v783_v30  ;;  %1578 = vmatprep.subr.bf16.mxu1 %v1912_v0 }
 0x838   :  { %1563 = vmatmul.mubr.msk.bf16.vlgmr.msra.gmra.mrb[24].mxu0 %vm218_vm2, %v785_v32 }
 0x839   :  { %1573 = vmatpush3.bf16.xpose.msra.mxu0 %v941_v33  ;;  %1574 = vmatprep.mubr.msk.bf16.mxu0 %vm1913_vm0, %v1912_v0 }
 0x83a   :  { %1584 = vmatprep.subr.bf16.mxu0 %v1912_v0 }
 0x83c   :  { %1569 = vmatmul.mubr.msk.bf16.vlgmr.msra.gmra.mrb[24].mxu1 %vm218_vm2, %v884_v34 }
 0x83d   :  { %1580 = vmatprep.mubr.msk.bf16.mxu1 %vm1913_vm0, %v1912_v0 }
 0x840   :  { %1575 = vmatmul.mubr.msk.bf16.vlgmr.msra.gmra.mrb[28].mxu0 %vm218_vm2, %v934_v35 }
 0x841   :  { %1586 = vmatprep.mubr.msk.bf16.mxu0 %vm1913_vm0, %v1912_v0 }
 0x907   :  { %v828_v36 = vpop.f32.mrb[20].mxu1 }
 0x908   :  { %v1558_v37 = vpop.f32.mrb[21].mxu1 }
 0x909   :  { %v831_v38 = vpop.f32.mrb[22].mxu1  ;;  %v1651_v37 = vld [vmem:[#allocation10 + $0x8] sm:$0xff]  }
 0x90a   :  { %v1559_v39 = vpop.f32.mrb[23].mxu1  ;;  %v1652_v38 = vld [vmem:[#allocation13] sm:$0xff]  }
 0x90b   :  { %v876_v40 = vpop.f32.mrb[24].mxu0  ;;  %v1653_v39 = vld [vmem:[#allocation13 + $0x8] sm:$0xff]  }
 0x90c   :  { %v882_v41 = vpack.c.bf16 %v876_v40, %v828_v36  ;;  %v1564_v42 = vpop.f32.mrb[25].mxu0  ;;  %v1650_v36 = vld [vmem:[#allocation10] sm:$0xff]   ;;  %v2274_v40 = vld [vmem:[#allocation14] sm:$0xf] }
 0x90d   :  { %v879_v43 = vpop.f32.mrb[26].mxu0 }
 0x90e   :  { %v1565_v44 = vpop.f32.mrb[27].mxu0 }
 0x90f   :  { %v927_v46 = vpop.f32.mrb[24].mxu1 }
 0x910   :  { %v983_v47 = vmul.f32 0.35355338, %v927_v46  ;;  %v1570_v48 = vpop.f32.mrb[25].mxu1 }
 0x911   :  { %v930_v51 = vpop.f32.mrb[26].mxu1 }
 0x912   :  { %v1571_v52 = vpop.f32.mrb[27].mxu1  ;;  %v985_v53 = vsel %vm218_vm2, %v983_v47, -inf }
 0x913   :  { %986 = vmax.xlane.f32.xlu0 %v985_v53  ;;  %v977_v54 = vpop.f32.mrb[28].mxu0  ;;  %v1654_v52 = vld [vmem:[#allocation13 + $0x10] sm:$0xff]   ;;  %v1655_v53 = vld [vmem:[#allocation13 + $0x18] sm:$0xff]  }
 0x914   :  { %v984_v55 = vmul.f32 0.35355338, %v977_v54  ;;  %v1576_v56 = vpop.f32.mrb[29].mxu0  ;;  %v1429_v54 = vld [vmem:[#allocation11] ss:$0 sm:$0xff] }
 0x915   :  { %v980_v58 = vpop.f32.mrb[30].mxu0 }
 0x916   :  { %v1577_v59 = vpop.f32.mrb[31].mxu0  ;;  %v988_v60 = vsel %vm218_vm2, %v984_v55, -inf }
 0x917   :  { %989 = vmax.xlane.f32.xlu1 %v988_v60 }
 0x928   :  { %1009 = vrot.lane.b32.xlu1 %v2117_v9, %s1923_s16 }
 0x92c   :  { %1107 = vrot.lane.b32.xlu1 %v659_v50, %s1924_s19 }
 0x930   :  { %1110 = vrot.lane.b32.xlu1 %v882_v41, %s1925_s20 }
 0x9a0   :  { %v987_v63 = vpop.xlane.xlu0 %986 }
 0x9a1   :  { %v991_v1 = vsub.f32 %v983_v47, %v987_v63 }
 0x9a3   :  { %v993_v2 = vmul.f32 1.442695, %v991_v1 }
 0x9a4   :  { %v990_v3 = vpop.xlane.xlu1 %989 }
 0x9a5   :  { %1680 = vpow2.f32 %v993_v2  ;;  %v992_v4 = vsub.f32 %v984_v55, %v990_v3 }
 0x9a7   :  { %v995_v5 = vmul.f32 1.442695, %v992_v4  ;;  %v1268_v4 = vsub.s32 1, %v2271_v61 }
 0x9a8   :  { %v1010_v6 = vpop.permute.xlu1 %1009 }
 0x9a9   :  { %1682 = vpow2.f32 %v995_v5  ;;  %v1015_v7 = vsel %vm344_vm3, %v1010_v6, 0  ;;  %v1269_v5 = vrot.slane %v2274_v40, %v1268_v4 }
 0x9aa   :  { %1579 = vmatpush3.bf16.msra.mxu1 %v1015_v7 }
 0x9ab   :  { %1590 = vmatprep.subr.bf16.mxu1 %v1912_v0 }
 0x9ac   :  { %v1108_v30 = vpop.permute.xlu1 %1107 }
 0x9ad   :  { %v1117_v32 = vsel %vm218_vm2, %v436_v62, %v1108_v30  ;;  %v1130_v62 = vsub.s32 0, %v2271_v61 }
 0x9af   :  { %v1681_v9 = vpop.eup %1680  ;;  %v1131_v41 = vrot.slane %v2274_v40, %v1130_v62 }
 0x9b0   :  { %v997_v45 = vsel %vm218_vm2, %v1681_v9, 0.0  ;;  %v1111_v31 = vpop.permute.xlu1 %1110 }
 0x9b1   :  { %998 = vadd.xlane.f32.xlu0 %v997_v45  ;;  %v1120_v33 = vsel %vm1118_vm4, %v1117_v32, %v1111_v31 }
 0x9b3   :  { %v1683_v49 = vpop.eup %1682 }
 0x9b4   :  { %v1000_v50 = vsel %vm218_vm2, %v1683_v49, 0.0 }
 0x9b5   :  { %1001 = vadd.xlane.f32.xlu0 %v1000_v50 }
 0x9cb   :  { %1057 = vrot.lane.b32.xlu0 %v2120_v12, %s1923_s16 }
 0xa3e   :  { %v999_v8 = vpop.xlane.xlu0 %998 }
 0xa3f   :  { %1684 = vrcp.f32 %v999_v8 }
 0xa42   :  { %v1002_v10 = vpop.xlane.xlu0 %1001 }
 0xa43   :  { %1686 = vrcp.f32 %v1002_v10 }
 0xa46   :  { %v1058_v11 = vpop.permute.xlu0 %1057 }
 0xa47   :  { %v1063_v13 = vsel %vm344_vm3, %v1058_v11, 0 }
 0xa48   :  { %1585 = vmatpush3.bf16.msra.mxu0 %v1063_v13 }
 0xa49   :  { %v1685_v14 = vpop.eup %1684  ;;  %1598 = vmatprep.subr.bf16.mxu0 %v1912_v0 }
 0xa4a   :  { %v1005_v15 = vmul.f32 %v1685_v14, %v1681_v9 }
 0xa4c   :  { %v1007_v16 = vpack.c.bf16 %v1005_v15, %v1005_v15 }
 0xa4d   :  { %v1687_v17 = vpop.eup %1686 }
 0xa4e   :  { %v1006_v18 = vmul.f32 %v1687_v17, %v1683_v49  ;;  %1581 = vmatmul.mubr.msk.bf16.vlgmr.msra.gmra.mrb[28].mxu1 %vm218_vm2, %v1007_v16 }
 0xa4f   :  { %1594 = vmatprep.mubr.msk.bf16.mxu1 %vm1913_vm0, %v1912_v0  ;;  %1591 = vmatpush3.bf16.msra.mxu1 %v1648_v19 }
 0xa50   :  { %v1008_v12 = vpack.c.bf16 %v1006_v18, %v1006_v18  ;;  %1592 = vmatprep.subr.bf16.mxu1 %v1912_v0 }
 0xa52   :  { %1587 = vmatmul.mubr.msk.bf16.vlgmr.msra.gmra.mrb[32].mxu0 %vm218_vm2, %v1008_v12 }
 0xa53   :  { %1602 = vmatprep.mubr.msk.bf16.mxu0 %vm1913_vm0, %v1912_v0  ;;  %1593 = vmatpush3.bf16.msra.mxu1 %v1649_v20 }
 0xa54   :  { %1606 = vmatprep.subr.bf16.mxu1 %v1912_v0  ;;  %1599 = vmatpush3.bf16.msra.mxu0 %v1650_v36 }
 0xa55   :  { %1600 = vmatprep.subr.bf16.mxu0 %v1912_v0 }
 0xa58   :  { %1601 = vmatpush3.bf16.msra.mxu0 %v1651_v37 }
 0xb21   :  { %v1051_v21 = vpop.f32.mrb[28].mxu1 }
 0xb22   :  { %v1582_v22 = vpop.f32.mrb[29].mxu1 }
 0xb23   :  { %v1054_v23 = vpop.f32.mrb[30].mxu1 }
 0xb24   :  { %v1583_v24 = vpop.f32.mrb[31].mxu1 }
 0xb25   :  { %v1099_v25 = vpop.f32.mrb[32].mxu0 }
 0xb26   :  { %v1105_v26 = vpack.c.bf16 %v1099_v25, %v1051_v21  ;;  %v1588_v27 = vpop.f32.mrb[33].mxu0 }
 0xb27   :  { %v1102_v28 = vpop.f32.mrb[34].mxu0 }
 0xb28   :  { %1113 = vrot.lane.b32.xlu0 %v1105_v26, %s1926_s21  ;;  %v1589_v29 = vpop.f32.mrb[35].mxu0  ;;  %v1370_v28 = vsub.s32 2, %v2271_v61 }
 0xb29   :  { %v1376_v29 = vsub.s32 3, %v2271_v61 }
 0xb2a   :  { %v1371_v30 = vrot.slane %v2274_v40, %v1370_v28 }
 0xb2b   :  { %v1377_v32 = vrot.slane %v2274_v40, %v1376_v29 }
 0xb9a   :  { %v1114_v34 = vpop.permute.xlu0 %1113 }
 0xb9b   :  { %v1123_v35 = vsel %vm1121_vm5, %v1120_v33, %v1114_v34 }
 0xb9c   :  { %1595 = vmatmul.mubr.msk.bf16.vlgmr.msra.gmra.mrb[32].mxu1 %vm164_vm1, %v1123_v35 }
 0xb9d   :  { %1614 = vmatprep.mubr.msk.bf16.mxu1 %vm1913_vm0, %v1912_v0  ;;  %1607 = vmatpush3.bf16.msra.mxu1 %v1652_v38 }
 0xb9e   :  { %1608 = vmatprep.subr.bf16.mxu1 %v1912_v0 }
 0xba1   :  { %1609 = vmatpush3.bf16.msra.mxu1 %v1653_v39 }
 0xba2   :  { %1610 = vmatprep.subr.bf16.mxu1 %v1912_v0 }
 0xba5   :  { %1611 = vmatpush3.bf16.msra.mxu1 %v1654_v52 }
 0xba6   :  { %1612 = vmatprep.subr.bf16.mxu1 %v1912_v0 }
 0xba9   :  { %1613 = vmatpush3.bf16.msra.mxu1 %v1655_v53 }
 0xc6f   :  { %v1180_v42 = vpop.f32.mrb[32].mxu1 }
 0xc70   :  { %v1596_v43 = vpop.f32.mrb[33].mxu1  ;;  %v1181_v46 = vadd.f32 %v1180_v42, %v1131_v41 }
 0xc71   :  { %v1183_v44 = vpop.f32.mrb[34].mxu1 }
 0xc72   :  { %v1184_v47 = vadd.f32 %v1183_v44, %v1131_v41  ;;  %v1597_v48 = vpop.f32.mrb[35].mxu1 }
 0xc74   :  { %v1187_v51 = vpack.c.bf16 %v1184_v47, %v1181_v46 }
 0xc76   :  { %1603 = vmatmul.mubr.msk.bf16.vlgmr.msra.gmra.mrb[36].mxu0 %vm164_vm1, %v1187_v51 }
 0xd49   :  { %v1248_v55 = vpop.f32.mrb[36].mxu0 }
 0xd4a   :  { %v1249_v56 = vadd.f32 %v1429_v54, %v1248_v55  ;;  %v1604_v58 = vpop.f32.mrb[37].mxu0 }
 0xd4b   :  { %v1251_v59 = vpop.f32.mrb[38].mxu0 }
 0xd4c   :  { %v1252_v60 = vadd.f32 %v1429_v54, %v1251_v59  ;;  %v1605_v63 = vpop.f32.mrb[39].mxu0  ;;  %v1255_v1 = vmax.f32 %v1249_v56, 0.0 }
 0xd4e   :  { %v1256_v2 = vmax.f32 %v1252_v60, 0.0 }
 0xd50   :  { %v1257_v3 = vpack.c.bf16 %v1256_v2, %v1255_v1 }
 0xd52   :  { %1615 = vmatmul.mubr.msk.bf16.vlgmr.msra.gmra.mrb[36].mxu1 %vm1294_vm6, %v1257_v3 }
 0xe25   :  { %v1332_v6 = vpop.f32.mrb[36].mxu1 }
 0xe26   :  { %v1333_v0 = vadd.f32 %v1332_v6, %v1269_v5  ;;  %v1616_v7 = vpop.f32.mrb[37].mxu1 }
 0xe27   :  { %v1335_v9 = vpop.f32.mrb[38].mxu1 }
 0xe28   :  { %v1336_v45 = vadd.f32 %v1335_v9, %v1269_v5  ;;  %v1617_v49 = vpop.f32.mrb[39].mxu1  ;;  %v1339_v50 = vadd.f32 %v1333_v0, %v1181_v46 }
 0xe2a   :  { %v1341_v8 = vsel %vm164_vm1, %v1339_v50, 0.0  ;;  %v1340_v10 = vadd.f32 %v1336_v45, %v1184_v47 }
 0xe2b   :  { %1342 = vadd.xlane.f32.xlu1 %v1341_v8 }
 0xe2c   :  { %v1344_v11 = vsel %vm164_vm1, %v1340_v10, 0.0 }
 0xe2d   :  { %1345 = vadd.xlane.f32.xlu0 %v1344_v11 }
 0xeb8   :  { %v1343_v13 = vpop.xlane.xlu1 %1342 }
 0xeb9   :  { %v1348_v14 = vmul.f32 0.03125, %v1343_v13 }
 0xeba   :  { %v1346_v15 = vpop.xlane.xlu0 %1345 }
 0xebb   :  { %v1350_v16 = vsub.f32 %v1339_v50, %v1348_v14  ;;  %v1349_v17 = vmul.f32 0.03125, %v1346_v15 }
 0xebd   :  { %v1351_v18 = vsub.f32 %v1340_v10, %v1349_v17  ;;  %v1352_v12 = vmul.f32 %v1350_v16, %v1350_v16 }
 0xebf   :  { %v1354_v19 = vsel %vm164_vm1, %v1352_v12, 0.0  ;;  %v1353_v20 = vmul.f32 %v1351_v18, %v1351_v18 }
 0xec0   :  { %1355 = vadd.xlane.f32.xlu0 %v1354_v19 }
 0xec1   :  { %v1357_v21 = vsel %vm164_vm1, %v1353_v20, 0.0 }
 0xec2   :  { %1358 = vadd.xlane.f32.xlu1 %v1357_v21 }
 0xf4d   :  { %v1356_v22 = vpop.xlane.xlu0 %1355 }
 0xf4e   :  { %v1360_v23 = vmul.f32 0.03125, %v1356_v22 }
 0xf4f   :  { %v1359_v24 = vpop.xlane.xlu1 %1358 }
 0xf50   :  { %v1362_v25 = vadd.f32 1e-06, %v1360_v23  ;;  %v1361_v26 = vmul.f32 0.03125, %v1359_v24 }
 0xf52   :  { %1688 = vrsqrt.f32 %v1362_v25  ;;  %v1363_v27 = vadd.f32 1e-06, %v1361_v26 }
 0xf54   :  { %1690 = vrsqrt.f32 %v1363_v27 }
 0xf5c   :  { %v1689_v31 = vpop.eup %1688 }
 0xf5d   :  { %v1366_v33 = vmul.f32 %v1689_v31, %v1350_v16 }
 0xf5e   :  { %v1691_v34 = vpop.eup %1690 }
 0xf5f   :  { %v1372_v35 = vmul.f32 %v1371_v30, %v1366_v33  ;;  %v1367_v36 = vmul.f32 %v1691_v34, %v1351_v18 }
 0xf61   :  { %v1373_v37 = vmul.f32 %v1371_v30, %v1367_v36  ;;  %v1378_v38 = vadd.f32 %v1377_v32, %v1372_v35 }
 0xf63   :  { %v1379_v39 = vadd.f32 %v1377_v32, %v1373_v37  ;;  %1380 = vst.msk [vmem:[#allocation16] sm:$0xff] %vm164_vm1, %v1378_v38 }
 0xf65   :  { %1381 = vst.msk [vmem:[#allocation16 + $0x8] sm:$0xff] %vm164_vm1, %v1379_v39 }
 0xf66   :  { %1879 = shalt.err (!%p1876_p12)
}
 0xf67   :  { %s1880_s15 = scalar_lea.hbm %s2312_s8, 256 }
 0xf68   :  { %p1881_p13 = scmp.ne.s32.totalorder %s2312_s8, %s1880_s15  ;;  %p1884_p0 = scmp.lt.u32.totalorder %s1880_s15, %s2312_s8 }
 0xf6a   :  { %p1886_p1 = pnand %p1884_p0, %p1881_p13 }
 0xf6c   :  { %1889 = shalt.err (!%p1886_p1)
}
 0xf6d   :  { %s1928_s26 = smov 128  }
 0xf6e   :  { %1393 = dma.vmem_to_hbm [thread:$0]  %s1388_s30, 256, %s2312_s8, [#allocation4], %s1928_s26, %s1928_s26, %s1924_s19  }
 0xf6f   :  { %1900 = dma.done.wait [#allocation4], 256  }
 0xf70   :  { %1901 = vsyncadd [#allocation4], 4294967040 }
 0xf71   :  { %1397 = vsyncpa [#allocation3], 1 }
 0xf72   :  { %1398 = vsyncpa [#allocation6], 1 }
 0xf73   :  { %1399 = vsyncpa [#allocation9], 1 }
 0xf74   :  { %1400 = vsyncpa [#allocation12], 1 }
 0xf75   :  { %1401 = vsyncpa [#allocation15], 1 }
 0xf76   :  { %1402 = vsyncpa [#allocation4], 1 }

</bundles_post_ra>
